<compile_context>
chip_gen: v5e
topology: v5e:2x2
jax: 0.10.0
libtpu: 0.0.40
codegen_flags: <defaults>
</compile_context>

<pallas_src>
import functools

import jax
import jax.numpy as jnp
from jax.experimental import pallas as pl
from jax.experimental.pallas import tpu as pltpu


def _round_up(x, m):
    return ((x + m - 1) // m) * m


def _tpu_traits():
    """Returns (bf16_vector_ok, tensorcores_per_device) from the device kind."""
    try:
        kind = jax.devices()[0].device_kind.lower()
    except Exception:
        return False, 1
    # v5e has no bf16 VPU/EUP path; v6e/v7x do.
    bf16_vec_ok = ("v6" in kind) or ("v7" in kind)
    # v7x (and megacore v4/v5p) expose 2 TensorCores behind one device; keep
    # multiple grid steps so the "parallel" batch axis can shard across them.
    two_cores = ("v7" in kind) or ("v4" in kind) or ("v5p" in kind)
    return bf16_vec_ok, (2 if two_cores else 1)


def _deeponet_kernel(xf_ref, xn_ref, xt_ref,
                     wf1_ref, bf1_ref, wf2_ref, bf2_ref,
                     wn1_ref, bn1_ref, wn2_ref, bn2_ref,
                     wt1_ref, bt1_ref, wt2_ref, bt2_ref,
                     out_ref, *, mm_dtype, tanh_dtype):
    """One batch tile: three 2-layer MLPs, elementwise product, sum over p."""

    def mlp(x_ref, w1_ref, b1_ref, w2_ref, b2_ref):
        # Cast to the MXU dtype in-kernel (VPU) - no separate HBM cast pass.
        x = x_ref[...].astype(mm_dtype)
        h = jnp.dot(x, w1_ref[...], preferred_element_type=jnp.float32)
        h = h + b1_ref[...]                       # bias add in f32
        h = jnp.tanh(h.astype(tanh_dtype))        # EUP; bf16 on v6e/v7x, f32 on v5e
        y = jnp.dot(h.astype(mm_dtype), w2_ref[...],
                    preferred_element_type=jnp.float32)
        return y + b2_ref[...]                    # f32 [TB, p]

    yf = mlp(xf_ref, wf1_ref, bf1_ref, wf2_ref, bf2_ref)
    yn = mlp(xn_ref, wn1_ref, bn1_ref, wn2_ref, bn2_ref)
    yt = mlp(xt_ref, wt1_ref, bt1_ref, wt2_ref, bt2_ref)

    z = (yf * yn) * yt                            # f32 on the VPU
    # keepdim sum over the p basis dim; (TB, 1) masked store (see header note).
    out_ref[...] = jnp.sum(z, axis=1, keepdims=True)


def deeponet_dual_branch(branch_f_input, branch_n_input, trunk_input, params,
                         *, block_b=2048, matmul_dtype=jnp.bfloat16):
    """DeepONetDualBranch forward as one gridded Pallas TPU kernel.

    params = [wf1, bf1, wf2, bf2, wn1, bn1, wn2, bn2, wt1, bt1, wt2, bt2]
    Weights are stored [in, out] so `x @ W + b` matches nn.Linear exactly.
    Biases may be 1-D (PyTorch style) or (1, dim); they are reshaped here.
    Pass matmul_dtype=None for exact f32 semantics (default bf16 at the MXU
    boundary with f32 accumulation).  Sweep block_b in {1024, 2048, 4096}.
    """
    (wf1, bf1, wf2, bf2,
     wn1, bn1, wn2, bn2,
     wt1, bt1, wt2, bt2) = params

    # Accept 1-D nn.Linear biases (review correctness concern #3).
    row = lambda b: jnp.asarray(b).reshape(1, -1)
    bf1, bf2, bn1, bn2, bt1, bt2 = map(row, (bf1, bf2, bn1, bn2, bt1, bt2))

    p = wf2.shape[1]
    assert wn2.shape[1] == p and wt2.shape[1] == p, "basis dims must match"
    batch = branch_f_input.shape[0]
    assert branch_n_input.shape[0] == batch and trunk_input.shape[0] == batch

    mm_dtype = jnp.float32 if matmul_dtype is None else matmul_dtype
    bf16_vec_ok, n_cores = _tpu_traits()
    tanh_dtype = (jnp.bfloat16
                  if (mm_dtype == jnp.bfloat16 and bf16_vec_ok)
                  else jnp.float32)

    # One-time tiny parameter casts (VMEM-resident inside the kernel).
    params_mm = [wf1.astype(mm_dtype), bf1.astype(jnp.float32),
                 wf2.astype(mm_dtype), bf2.astype(jnp.float32),
                 wn1.astype(mm_dtype), bn1.astype(jnp.float32),
                 wn2.astype(mm_dtype), bn2.astype(jnp.float32),
                 wt1.astype(mm_dtype), bt1.astype(jnp.float32),
                 wt2.astype(mm_dtype), bt2.astype(jnp.float32)]

    # Batch tile: as big as useful (per-step overhead amortization), capped so
    # a multi-TensorCore device still gets >= n_cores grid steps.
    tb = min(block_b, _round_up(batch, 8))
    if n_cores > 1:
        tb = min(tb, max(8, _round_up(pl.cdiv(batch, n_cores), 8)))
    grid = (pl.cdiv(batch, tb),)

    def act_spec(d):
        # Streamed activation tile [tb, d]; trailing partial block is handled
        # by Pallas (padded read, clipped write), so no wrapper-side jnp.pad.
        return pl.BlockSpec((tb, d), lambda i: (i, 0))

    def resident(arr):
        # Same block every grid step -> fetched once, stays in VMEM.
        return pl.BlockSpec(arr.shape, lambda i: (0,) * arr.ndim)

    kernel = functools.partial(_deeponet_kernel,
                               mm_dtype=mm_dtype, tanh_dtype=tanh_dtype)

    out = pl.pallas_call(
        kernel,
        out_shape=jax.ShapeDtypeStruct((batch, 1), jnp.float32),
        grid=grid,
        in_specs=[act_spec(branch_f_input.shape[1]),
                  act_spec(branch_n_input.shape[1]),
                  act_spec(trunk_input.shape[1])]
                 + [resident(a) for a in params_mm],
        out_specs=pl.BlockSpec((tb, 1), lambda i: (i, 0)),
        compiler_params=pltpu.CompilerParams(
            dimension_semantics=("parallel",)),
    )(branch_f_input, branch_n_input, trunk_input, *params_mm)

    return out


# ----------------------------------------------------------------------------
# Demo / self-check
# ----------------------------------------------------------------------------
def make_mlp_params(key, in_dim, hidden_dim, out_dim):
    k1, k2, k3, k4 = jax.random.split(key, 4)
    w1 = jax.random.normal(k1, (in_dim, hidden_dim), jnp.float32) * 0.1
    b1 = jax.random.normal(k2, (1, hidden_dim), jnp.float32) * 0.1
    w2 = jax.random.normal(k3, (hidden_dim, out_dim), jnp.float32) * 0.1
    b2 = jax.random.normal(k4, (1, out_dim), jnp.float32) * 0.1
    return [w1, b1, w2, b2]


def reference_forward(bf, bn, tr, params):
    def linear(x, w, b):
        return jnp.dot(x, w, preferred_element_type=jnp.float32) + b.reshape(1, -1)

    def mlp(x, pr):
        w1, b1, w2, b2 = pr
        return linear(jnp.tanh(linear(x, w1, b1)), w2, b2)

    f = mlp(bf, params[0:4])
    n = mlp(bn, params[4:8])
    t = mlp(tr, params[8:12])
    return jnp.sum(f * n * t, axis=1, keepdims=True)


if __name__ == "__main__":
    key = jax.random.PRNGKey(0)
    k_bf, k_bn, k_tr, k_pf, k_pn, k_pt = jax.random.split(key, 6)

    B = 200          # batch (not a tile multiple -> exercises the padded tail)
    m_f = 16         # branch_f sensor dim
    m_n = 16         # branch_n sensor dim
    d_t = 8          # trunk coordinate dim
    hidden = 32      # MLP hidden width
    p = 64           # DeepONet basis dim (shared output width of all nets)

    branch_f_input = jax.random.normal(k_bf, (B, m_f), jnp.float32)
    branch_n_input = jax.random.normal(k_bn, (B, m_n), jnp.float32)
    trunk_input = jax.random.normal(k_tr, (B, d_t), jnp.float32)

    params = (
        make_mlp_params(k_pf, m_f, hidden, p)
        + make_mlp_params(k_pn, m_n, hidden, p)
        + make_mlp_params(k_pt, d_t, hidden, p)
    )

    out = deeponet_dual_branch(branch_f_input, branch_n_input, trunk_input,
                               params)
    out = jax.block_until_ready(out)
    assert out.shape == (B, 1), out.shape

    # Check against exact f32 module semantics (tolerance sized for the
    # bf16-at-MXU fast path; pass matmul_dtype=None for exact f32).
    ref = reference_forward(branch_f_input, branch_n_input, trunk_input, params)
    max_err = float(jnp.max(jnp.abs(out - ref)))
    assert max_err < 5e-2, f"max abs err vs f32 reference: {max_err}"

    print("KERNEL_OK")
</pallas_src>

<mosaic_0001>
module attributes {stable_mosaic.version = 11 : i64} {
  func.func @_deeponet_kernel(%arg0: i32, %arg1: memref<200x16xf32, #tpu.memory_space<vmem>>, %arg2: memref<200x16xf32, #tpu.memory_space<vmem>>, %arg3: memref<200x8xf32, #tpu.memory_space<vmem>>, %arg4: memref<16x32xbf16, #tpu.memory_space<vmem>>, %arg5: memref<1x32xf32, #tpu.memory_space<vmem>>, %arg6: memref<32x64xbf16, #tpu.memory_space<vmem>>, %arg7: memref<1x64xf32, #tpu.memory_space<vmem>>, %arg8: memref<16x32xbf16, #tpu.memory_space<vmem>>, %arg9: memref<1x32xf32, #tpu.memory_space<vmem>>, %arg10: memref<32x64xbf16, #tpu.memory_space<vmem>>, %arg11: memref<1x64xf32, #tpu.memory_space<vmem>>, %arg12: memref<8x32xbf16, #tpu.memory_space<vmem>>, %arg13: memref<1x32xf32, #tpu.memory_space<vmem>>, %arg14: memref<32x64xbf16, #tpu.memory_space<vmem>>, %arg15: memref<1x64xf32, #tpu.memory_space<vmem>>, %arg16: memref<200x1xf32, #tpu.memory_space<vmem>>) attributes {dimension_semantics = [#tpu.dimension_semantics<parallel>], iteration_bounds = array<i64: 1>, scalar_prefetch = 0 : i64, scratch_operands = 0 : i64, tpu.core_type = #tpu.core_type<tc>, window_params = [{transform_indices = @transform_0, window_bounds = array<i64: 200, 16>}, {transform_indices = @transform_1, window_bounds = array<i64: 200, 16>}, {transform_indices = @transform_2, window_bounds = array<i64: 200, 8>}, {pipeline_mode = #tpu.pipeline_mode<synchronous>, transform_indices = @transform_3, window_bounds = array<i64: 16, 32>}, {pipeline_mode = #tpu.pipeline_mode<synchronous>, transform_indices = @transform_4, window_bounds = array<i64: 1, 32>}, {pipeline_mode = #tpu.pipeline_mode<synchronous>, transform_indices = @transform_5, window_bounds = array<i64: 32, 64>}, {pipeline_mode = #tpu.pipeline_mode<synchronous>, transform_indices = @transform_6, window_bounds = array<i64: 1, 64>}, {pipeline_mode = #tpu.pipeline_mode<synchronous>, transform_indices = @transform_7, window_bounds = array<i64: 16, 32>}, {pipeline_mode = #tpu.pipeline_mode<synchronous>, transform_indices = @transform_8, window_bounds = array<i64: 1, 32>}, {pipeline_mode = #tpu.pipeline_mode<synchronous>, transform_indices = @transform_9, window_bounds = array<i64: 32, 64>}, {pipeline_mode = #tpu.pipeline_mode<synchronous>, transform_indices = @transform_10, window_bounds = array<i64: 1, 64>}, {pipeline_mode = #tpu.pipeline_mode<synchronous>, transform_indices = @transform_11, window_bounds = array<i64: 8, 32>}, {pipeline_mode = #tpu.pipeline_mode<synchronous>, transform_indices = @transform_12, window_bounds = array<i64: 1, 32>}, {pipeline_mode = #tpu.pipeline_mode<synchronous>, transform_indices = @transform_13, window_bounds = array<i64: 32, 64>}, {pipeline_mode = #tpu.pipeline_mode<synchronous>, transform_indices = @transform_14, window_bounds = array<i64: 1, 64>}, {transform_indices = @transform_15, window_bounds = array<i64: 200, 1>}]} {
    %c0 = arith.constant 0 : index
    %c0_0 = arith.constant 0 : index
    %0 = vector.load %arg1[%c0, %c0_0] : memref<200x16xf32, #tpu.memory_space<vmem>>, vector<200x16xf32>
    %1 = arith.truncf %0 : vector<200x16xf32> to vector<200x16xbf16>
    %c0_1 = arith.constant 0 : index
    %c0_2 = arith.constant 0 : index
    %2 = vector.load %arg4[%c0_1, %c0_2] : memref<16x32xbf16, #tpu.memory_space<vmem>>, vector<16x32xbf16>
    %cst = arith.constant dense<0.000000e+00> : vector<200x32xf32>
    %3 = tpu.matmul %1, %2, %cst {dimension_numbers = #tpu.dot_dimension_numbers<[1], [0], [0], [1], [0, 0, 1, 1], [], []>} : vector<200x16xbf16>, vector<16x32xbf16>, vector<200x32xf32> -> vector<200x32xf32>
    %c0_3 = arith.constant 0 : index
    %c0_4 = arith.constant 0 : index
    %4 = vector.load %arg5[%c0_3, %c0_4] : memref<1x32xf32, #tpu.memory_space<vmem>>, vector<1x32xf32>
    %5 = vector.broadcast %4 : vector<1x32xf32> to vector<200x32xf32>
    %6 = arith.addf %3, %5 : vector<200x32xf32>
    %7 = math.tanh %6 : vector<200x32xf32>
    %8 = arith.truncf %7 : vector<200x32xf32> to vector<200x32xbf16>
    %c0_5 = arith.constant 0 : index
    %c0_6 = arith.constant 0 : index
    %9 = vector.load %arg6[%c0_5, %c0_6] : memref<32x64xbf16, #tpu.memory_space<vmem>>, vector<32x64xbf16>
    %cst_7 = arith.constant dense<0.000000e+00> : vector<200x64xf32>
    %10 = tpu.matmul %8, %9, %cst_7 {dimension_numbers = #tpu.dot_dimension_numbers<[1], [0], [0], [1], [0, 0, 1, 1], [], []>} : vector<200x32xbf16>, vector<32x64xbf16>, vector<200x64xf32> -> vector<200x64xf32>
    %c0_8 = arith.constant 0 : index
    %c0_9 = arith.constant 0 : index
    %11 = vector.load %arg7[%c0_8, %c0_9] : memref<1x64xf32, #tpu.memory_space<vmem>>, vector<1x64xf32>
    %12 = vector.broadcast %11 : vector<1x64xf32> to vector<200x64xf32>
    %13 = arith.addf %10, %12 : vector<200x64xf32>
    %c0_10 = arith.constant 0 : index
    %c0_11 = arith.constant 0 : index
    %14 = vector.load %arg2[%c0_10, %c0_11] : memref<200x16xf32, #tpu.memory_space<vmem>>, vector<200x16xf32>
    %15 = arith.truncf %14 : vector<200x16xf32> to vector<200x16xbf16>
    %c0_12 = arith.constant 0 : index
    %c0_13 = arith.constant 0 : index
    %16 = vector.load %arg8[%c0_12, %c0_13] : memref<16x32xbf16, #tpu.memory_space<vmem>>, vector<16x32xbf16>
    %cst_14 = arith.constant dense<0.000000e+00> : vector<200x32xf32>
    %17 = tpu.matmul %15, %16, %cst_14 {dimension_numbers = #tpu.dot_dimension_numbers<[1], [0], [0], [1], [0, 0, 1, 1], [], []>} : vector<200x16xbf16>, vector<16x32xbf16>, vector<200x32xf32> -> vector<200x32xf32>
    %c0_15 = arith.constant 0 : index
    %c0_16 = arith.constant 0 : index
    %18 = vector.load %arg9[%c0_15, %c0_16] : memref<1x32xf32, #tpu.memory_space<vmem>>, vector<1x32xf32>
    %19 = vector.broadcast %18 : vector<1x32xf32> to vector<200x32xf32>
    %20 = arith.addf %17, %19 : vector<200x32xf32>
    %21 = math.tanh %20 : vector<200x32xf32>
    %22 = arith.truncf %21 : vector<200x32xf32> to vector<200x32xbf16>
    %c0_17 = arith.constant 0 : index
    %c0_18 = arith.constant 0 : index
    %23 = vector.load %arg10[%c0_17, %c0_18] : memref<32x64xbf16, #tpu.memory_space<vmem>>, vector<32x64xbf16>
    %cst_19 = arith.constant dense<0.000000e+00> : vector<200x64xf32>
    %24 = tpu.matmul %22, %23, %cst_19 {dimension_numbers = #tpu.dot_dimension_numbers<[1], [0], [0], [1], [0, 0, 1, 1], [], []>} : vector<200x32xbf16>, vector<32x64xbf16>, vector<200x64xf32> -> vector<200x64xf32>
    %c0_20 = arith.constant 0 : index
    %c0_21 = arith.constant 0 : index
    %25 = vector.load %arg11[%c0_20, %c0_21] : memref<1x64xf32, #tpu.memory_space<vmem>>, vector<1x64xf32>
    %26 = vector.broadcast %25 : vector<1x64xf32> to vector<200x64xf32>
    %27 = arith.addf %24, %26 : vector<200x64xf32>
    %c0_22 = arith.constant 0 : index
    %c0_23 = arith.constant 0 : index
    %28 = vector.load %arg3[%c0_22, %c0_23] : memref<200x8xf32, #tpu.memory_space<vmem>>, vector<200x8xf32>
    %29 = arith.truncf %28 : vector<200x8xf32> to vector<200x8xbf16>
    %c0_24 = arith.constant 0 : index
    %c0_25 = arith.constant 0 : index
    %30 = vector.load %arg12[%c0_24, %c0_25] : memref<8x32xbf16, #tpu.memory_space<vmem>>, vector<8x32xbf16>
    %cst_26 = arith.constant dense<0.000000e+00> : vector<200x32xf32>
    %31 = tpu.matmul %29, %30, %cst_26 {dimension_numbers = #tpu.dot_dimension_numbers<[1], [0], [0], [1], [0, 0, 1, 1], [], []>} : vector<200x8xbf16>, vector<8x32xbf16>, vector<200x32xf32> -> vector<200x32xf32>
    %c0_27 = arith.constant 0 : index
    %c0_28 = arith.constant 0 : index
    %32 = vector.load %arg13[%c0_27, %c0_28] : memref<1x32xf32, #tpu.memory_space<vmem>>, vector<1x32xf32>
    %33 = vector.broadcast %32 : vector<1x32xf32> to vector<200x32xf32>
    %34 = arith.addf %31, %33 : vector<200x32xf32>
    %35 = math.tanh %34 : vector<200x32xf32>
    %36 = arith.truncf %35 : vector<200x32xf32> to vector<200x32xbf16>
    %c0_29 = arith.constant 0 : index
    %c0_30 = arith.constant 0 : index
    %37 = vector.load %arg14[%c0_29, %c0_30] : memref<32x64xbf16, #tpu.memory_space<vmem>>, vector<32x64xbf16>
    %cst_31 = arith.constant dense<0.000000e+00> : vector<200x64xf32>
    %38 = tpu.matmul %36, %37, %cst_31 {dimension_numbers = #tpu.dot_dimension_numbers<[1], [0], [0], [1], [0, 0, 1, 1], [], []>} : vector<200x32xbf16>, vector<32x64xbf16>, vector<200x64xf32> -> vector<200x64xf32>
    %c0_32 = arith.constant 0 : index
    %c0_33 = arith.constant 0 : index
    %39 = vector.load %arg15[%c0_32, %c0_33] : memref<1x64xf32, #tpu.memory_space<vmem>>, vector<1x64xf32>
    %40 = vector.broadcast %39 : vector<1x64xf32> to vector<200x64xf32>
    %41 = arith.addf %38, %40 : vector<200x64xf32>
    %42 = arith.mulf %13, %27 : vector<200x64xf32>
    %43 = arith.mulf %42, %41 : vector<200x64xf32>
    %cst_34 = arith.constant dense<0.000000e+00> : vector<200xf32>
    %44 = vector.multi_reduction <add>, %43, %cst_34 [1] : vector<200x64xf32> to vector<200xf32>
    %45 = vector.shape_cast %44 : vector<200xf32> to vector<200x1xf32>
    %c0_35 = arith.constant 0 : index
    %c0_36 = arith.constant 0 : index
    %46 = vector.load %arg16[%c0_35, %c0_36] : memref<200x1xf32, #tpu.memory_space<vmem>>, vector<200x1xf32>
    tpu.vector_store %arg16[%c0_35, %c0_36], %45 {strides = array<i32>} : memref<200x1xf32, #tpu.memory_space<vmem>>, vector<200x1xf32>,
    return
  }
  func.func @transform_0(%arg0: i32) -> (i32, i32) {
    %c0_i32 = arith.constant 0 : i32
    %c0_i32_0 = arith.constant 0 : i32
    return %arg0, %c0_i32 : i32, i32
  }
  func.func @transform_1(%arg0: i32) -> (i32, i32) {
    %c0_i32 = arith.constant 0 : i32
    %c0_i32_0 = arith.constant 0 : i32
    return %arg0, %c0_i32 : i32, i32
  }
  func.func @transform_2(%arg0: i32) -> (i32, i32) {
    %c0_i32 = arith.constant 0 : i32
    %c0_i32_0 = arith.constant 0 : i32
    return %arg0, %c0_i32 : i32, i32
  }
  func.func @transform_3(%arg0: i32) -> (i32, i32) {
    %c0_i32 = arith.constant 0 : i32
    %c0_i32_0 = arith.constant 0 : i32
    %c0_i32_1 = arith.constant 0 : i32
    return %c0_i32, %c0_i32_0 : i32, i32
  }
  func.func @transform_4(%arg0: i32) -> (i32, i32) {
    %c0_i32 = arith.constant 0 : i32
    %c0_i32_0 = arith.constant 0 : i32
    %c0_i32_1 = arith.constant 0 : i32
    return %c0_i32, %c0_i32_0 : i32, i32
  }
  func.func @transform_5(%arg0: i32) -> (i32, i32) {
    %c0_i32 = arith.constant 0 : i32
    %c0_i32_0 = arith.constant 0 : i32
    %c0_i32_1 = arith.constant 0 : i32
    return %c0_i32, %c0_i32_0 : i32, i32
  }
  func.func @transform_6(%arg0: i32) -> (i32, i32) {
    %c0_i32 = arith.constant 0 : i32
    %c0_i32_0 = arith.constant 0 : i32
    %c0_i32_1 = arith.constant 0 : i32
    return %c0_i32, %c0_i32_0 : i32, i32
  }
  func.func @transform_7(%arg0: i32) -> (i32, i32) {
    %c0_i32 = arith.constant 0 : i32
    %c0_i32_0 = arith.constant 0 : i32
    %c0_i32_1 = arith.constant 0 : i32
    return %c0_i32, %c0_i32_0 : i32, i32
  }
  func.func @transform_8(%arg0: i32) -> (i32, i32) {
    %c0_i32 = arith.constant 0 : i32
    %c0_i32_0 = arith.constant 0 : i32
    %c0_i32_1 = arith.constant 0 : i32
    return %c0_i32, %c0_i32_0 : i32, i32
  }
  func.func @transform_9(%arg0: i32) -> (i32, i32) {
    %c0_i32 = arith.constant 0 : i32
    %c0_i32_0 = arith.constant 0 : i32
    %c0_i32_1 = arith.constant 0 : i32
    return %c0_i32, %c0_i32_0 : i32, i32
  }
  func.func @transform_10(%arg0: i32) -> (i32, i32) {
    %c0_i32 = arith.constant 0 : i32
    %c0_i32_0 = arith.constant 0 : i32
    %c0_i32_1 = arith.constant 0 : i32
    return %c0_i32, %c0_i32_0 : i32, i32
  }
  func.func @transform_11(%arg0: i32) -> (i32, i32) {
    %c0_i32 = arith.constant 0 : i32
    %c0_i32_0 = arith.constant 0 : i32
    %c0_i32_1 = arith.constant 0 : i32
    return %c0_i32, %c0_i32_0 : i32, i32
  }
  func.func @transform_12(%arg0: i32) -> (i32, i32) {
    %c0_i32 = arith.constant 0 : i32
    %c0_i32_0 = arith.constant 0 : i32
    %c0_i32_1 = arith.constant 0 : i32
    return %c0_i32, %c0_i32_0 : i32, i32
  }
  func.func @transform_13(%arg0: i32) -> (i32, i32) {
    %c0_i32 = arith.constant 0 : i32
    %c0_i32_0 = arith.constant 0 : i32
    %c0_i32_1 = arith.constant 0 : i32
    return %c0_i32, %c0_i32_0 : i32, i32
  }
  func.func @transform_14(%arg0: i32) -> (i32, i32) {
    %c0_i32 = arith.constant 0 : i32
    %c0_i32_0 = arith.constant 0 : i32
    %c0_i32_1 = arith.constant 0 : i32
    return %c0_i32, %c0_i32_0 : i32, i32
  }
  func.func @transform_15(%arg0: i32) -> (i32, i32) {
    %c0_i32 = arith.constant 0 : i32
    %c0_i32_0 = arith.constant 0 : i32
    return %arg0, %c0_i32 : i32, i32
  }
}

</mosaic_0001>

<bundles_post_ra>
// kernel: tpu_custom_call.1
= control target key start
LH: loop header
LB: loop body
LE: loop exit
PB: predicated region body
PF: predicated region fallthrough
CT: control target
= control target key end

     0   :  { %vm800_vm0 = vcmask 1043456   ;;  %vm101_vm1 = vcmask 130048   ;;  %vm760_vm2 = vcmask 64512   ;;  %vm272_vm3 = vcmask 261120   ;;  %s2335_s3 = inlined_call_operand.vmem [shape: bf16[16,32], index: 3, kind: input, shape index: {}]   ;;  %s2336_s7 = inlined_call_operand.vmem [shape: bf16[16,32], index: 7, kind: input, shape index: {}]   ;;  %s2337_s0 = inlined_call_operand.vmem [shape: f32[200,16], index: 0, kind: input, shape index: {}]   ;;  %s2338_s1 = inlined_call_operand.vmem [shape: f32[200,16], index: 1, kind: input, shape index: {}]   ;;  %s2339_s11 = inlined_call_operand.vmem [shape: bf16[8,32], index: 11, kind: input, shape index: {}]   ;;  %s2340_s4 = inlined_call_operand.vmem [shape: f32[1,32], index: 4, kind: input, shape index: {}]   ;;  %s2341_s8 = inlined_call_operand.vmem [shape: f32[1,32], index: 8, kind: input, shape index: {}]   ;;  %s2342_s5 = inlined_call_operand.vmem [shape: bf16[32,64], index: 5, kind: input, shape index: {}]   ;;  %s2343_s2 = inlined_call_operand.vmem [shape: f32[200,8], index: 2, kind: input, shape index: {}]   ;;  %s2344_s9 = inlined_call_operand.vmem [shape: bf16[32,64], index: 9, kind: input, shape index: {}]   ;;  %s2345_s12 = inlined_call_operand.vmem [shape: f32[1,32], index: 12, kind: input, shape index: {}]   ;;  %s2346_s13 = inlined_call_operand.vmem [shape: bf16[32,64], index: 13, kind: input, shape index: {}]   ;;  %s2347_s6 = inlined_call_operand.vmem [shape: f32[1,64], index: 6, kind: input, shape index: {}]   ;;  %s2348_s10 = inlined_call_operand.vmem [shape: f32[1,64], index: 10, kind: input, shape index: {}]   ;;  %s2349_s14 = inlined_call_operand.vmem [shape: f32[1,64], index: 14, kind: input, shape index: {}]   ;;  %s2350_s15 = inlined_call_operand.vmem [shape: f32[200,1], index: 15, kind: output, shape index: {}]  }
   0x1   :  { %v1313_v0 = vld [vmem:[%s2335_s3] sm:$0xff]  ;;  %v52_v3 = vld [vmem:[%s2337_s0 + $0x8] sm:$0xff]  ;;  %v53_v10 = vld [vmem:[%s2337_s0 + $0x10] sm:$0xff]  ;;  %vm1097_vm4 = vcmask 523264   ;;  %vm1173_vm5 = vcmask 7168  }
   0x2   :  { %v1316_v1 = vld [vmem:[%s2336_s7] sm:$0xff]  ;;  %v386_v5 = vld [vmem:[%s2338_s1 + $0x8] sm:$0xff]  ;;  %148 = vmatpush.bf16.msra.mxu0 %v1313_v0  ;;  %1321 = vmatpush.bf16.msra.mxu1 %v1313_v0  ;;  %v54_v11 = vld [vmem:[%s2337_s0 + $0x18] sm:$0xff] }
   0x3   :  { %v51_v2 = vld [vmem:[%s2337_s0] sm:$0xff]  ;;  %481 = vmatpush.bf16.msra.mxu2 %v1316_v1  ;;  %1322 = vmatpush.bf16.msra.mxu3 %v1316_v1  ;;  %v387_v12 = vld [vmem:[%s2338_s1 + $0x10] sm:$0xff]  ;;  %v388_v13 = vld [vmem:[%s2338_s1 + $0x18] sm:$0xff]  ;;  %v77_v14 = vpack.c.bf16 %v54_v11, %v53_v10 }
   0x4   :  { %v385_v4 = vld [vmem:[%s2338_s1] sm:$0xff]  ;;  %v76_v6 = vpack.c.bf16 %v52_v3, %v51_v2  ;;  %v411_v15 = vpack.c.bf16 %v388_v13, %v387_v12  ;;  %v65_v16 = vld [vmem:[%s2337_s0 + $0x70] sm:$0xff]  ;;  %v66_v17 = vld [vmem:[%s2337_s0 + $0x78] sm:$0xff] }
   0x5   :  { %v410_v7 = vpack.c.bf16 %v386_v5, %v385_v4  ;;  %v755_v8 = vld [vmem:[%s2339_s11] sm:$0xf]  ;;  %v83_v18 = vpack.c.bf16 %v66_v17, %v65_v16  ;;  %v399_v19 = vld [vmem:[%s2338_s1 + $0x70] sm:$0xff]  ;;  %v400_v20 = vld [vmem:[%s2338_s1 + $0x78] sm:$0xff] }
   0x6   :  { %v802_v9 = vsel %vm800_vm0, %v755_v8, 0  ;;  %1207 = vmatmul.msk.bf16.vlgmr.msra.gmra.mxu0 %vm101_vm1, %v76_v6  ;;  %v417_v21 = vpack.c.bf16 %v400_v20, %v399_v19  ;;  %v55_v22 = vld [vmem:[%s2337_s0 + $0x20] sm:$0xff]  ;;  %v56_v23 = vld [vmem:[%s2337_s0 + $0x28] sm:$0xff]  ;;  %v57_v34 = vld [vmem:[%s2337_s0 + $0x30] sm:$0xff] }
   0x7   :  { %811 = vmatpush.bf16.msrb.mxu0 %v802_v9  ;;  %1245 = vmatmul.msk.bf16.vlgmr.msra.gmra.mxu2 %vm101_vm1, %v410_v7  ;;  %v389_v24 = vld [vmem:[%s2338_s1 + $0x20] sm:$0xff]  ;;  %v390_v25 = vld [vmem:[%s2338_s1 + $0x28] sm:$0xff]  ;;  %v78_v26 = vpack.c.bf16 %v56_v23, %v55_v22  ;;  %v58_v35 = vld [vmem:[%s2337_s0 + $0x38] sm:$0xff] }
   0x8   :  { %1214 = vmatmul.msk.bf16.vlgmr.msra.gmra.mxu1 %vm101_vm1, %v83_v18  ;;  %1252 = vmatmul.msk.bf16.vlgmr.msra.gmra.mxu3 %vm101_vm1, %v417_v21  ;;  %v412_v27 = vpack.c.bf16 %v390_v25, %v389_v24  ;;  %v67_v28 = vld [vmem:[%s2337_s0 + $0x80] sm:$0xff]  ;;  %v68_v29 = vld [vmem:[%s2337_s0 + $0x88] sm:$0xff]  ;;  %v391_v36 = vld [vmem:[%s2338_s1 + $0x30] sm:$0xff]  ;;  %v79_v38 = vpack.c.bf16 %v58_v35, %v57_v34 }
   0x9   :  { %v84_v30 = vpack.c.bf16 %v68_v29, %v67_v28  ;;  %v401_v31 = vld [vmem:[%s2338_s1 + $0x80] sm:$0xff]  ;;  %v402_v32 = vld [vmem:[%s2338_s1 + $0x88] sm:$0xff]  ;;  %v392_v37 = vld [vmem:[%s2338_s1 + $0x38] sm:$0xff] }
   0xa   :  { %v418_v33 = vpack.c.bf16 %v402_v32, %v401_v31  ;;  %v413_v39 = vpack.c.bf16 %v392_v37, %v391_v36  ;;  %v69_v40 = vld [vmem:[%s2337_s0 + $0x90] sm:$0xff]  ;;  %v70_v41 = vld [vmem:[%s2337_s0 + $0x98] sm:$0xff]  ;;  %v59_v46 = vld [vmem:[%s2337_s0 + $0x40] sm:$0xff] }
   0xb   :  { %v85_v42 = vpack.c.bf16 %v70_v41, %v69_v40  ;;  %v403_v43 = vld [vmem:[%s2338_s1 + $0x90] sm:$0xff]  ;;  %v404_v44 = vld [vmem:[%s2338_s1 + $0x98] sm:$0xff]  ;;  %v60_v47 = vld [vmem:[%s2337_s0 + $0x48] sm:$0xff] }
   0xc   :  { %v419_v45 = vpack.c.bf16 %v404_v44, %v403_v43  ;;  %v393_v48 = vld [vmem:[%s2338_s1 + $0x40] sm:$0xff]  ;;  %v394_v49 = vld [vmem:[%s2338_s1 + $0x48] sm:$0xff]  ;;  %v80_v50 = vpack.c.bf16 %v60_v47, %v59_v46  ;;  %v61_v58 = vld [vmem:[%s2337_s0 + $0x50] sm:$0xff] }
   0xd   :  { %v414_v51 = vpack.c.bf16 %v394_v49, %v393_v48  ;;  %v71_v52 = vld [vmem:[%s2337_s0 + $0xa0] sm:$0xff]  ;;  %v72_v53 = vld [vmem:[%s2337_s0 + $0xa8] sm:$0xff]  ;;  %v62_v59 = vld [vmem:[%s2337_s0 + $0x58] sm:$0xff] }
   0xe   :  { %v86_v54 = vpack.c.bf16 %v72_v53, %v71_v52  ;;  %v405_v55 = vld [vmem:[%s2338_s1 + $0xa0] sm:$0xff]  ;;  %v406_v56 = vld [vmem:[%s2338_s1 + $0xa8] sm:$0xff]  ;;  %v395_v60 = vld [vmem:[%s2338_s1 + $0x50] sm:$0xff]  ;;  %v81_v62 = vpack.c.bf16 %v62_v59, %v61_v58 }
   0xf   :  { %v420_v57 = vpack.c.bf16 %v406_v56, %v405_v55  ;;  %v396_v61 = vld [vmem:[%s2338_s1 + $0x58] sm:$0xff]  ;;  %v73_v0 = vld [vmem:[%s2337_s0 + $0xb0] sm:$0xff]  ;;  %v63_v6 = vld [vmem:[%s2337_s0 + $0x60] sm:$0xff] }
  0x10   :  { %v415_v63 = vpack.c.bf16 %v396_v61, %v395_v60  ;;  %v74_v1 = vld [vmem:[%s2337_s0 + $0xb8] sm:$0xff]  ;;  %v407_v3 = vld [vmem:[%s2338_s1 + $0xb0] sm:$0xff]  ;;  %v64_v7 = vld [vmem:[%s2337_s0 + $0x68] sm:$0xff] }
  0x11   :  { %v87_v2 = vpack.c.bf16 %v74_v1, %v73_v0  ;;  %v408_v4 = vld [vmem:[%s2338_s1 + $0xb8] sm:$0xff]  ;;  %v397_v8 = vld [vmem:[%s2338_s1 + $0x60] sm:$0xff]  ;;  %v398_v9 = vld [vmem:[%s2338_s1 + $0x68] sm:$0xff]  ;;  %v82_v10 = vpack.c.bf16 %v64_v7, %v63_v6 }
  0x12   :  { %v421_v5 = vpack.c.bf16 %v408_v4, %v407_v3  ;;  %v416_v11 = vpack.c.bf16 %v398_v9, %v397_v8  ;;  %v75_v12 = vld [vmem:[%s2337_s0 + $0xc0] sm:$0xff]  ;;  %v1315_v16 = vld [vmem:[%s2342_s5 + $0x8] sm:$0xff]  ;;  %v719_v24 = vld [vmem:[%s2343_s2 + $0x10] sm:$0xff] }
  0x13   :  { %v88_v13 = vpack.c.bf16 %v75_v12, %v75_v12  ;;  %v717_v17 = vld [vmem:[%s2343_s2] sm:$0xff]  ;;  %v718_v18 = vld [vmem:[%s2343_s2 + $0x8] sm:$0xff]  ;;  %318 = vmatpush.bf16.msrb.mxu1 %v1315_v16  ;;  %v720_v25 = vld [vmem:[%s2343_s2 + $0x18] sm:$0xff] }
  0x14   :  { %v742_v19 = vpack.c.bf16 %v718_v18, %v717_v17  ;;  %v1314_v20 = vld [vmem:[%s2342_s5] sm:$0xff]  ;;  %v1318_v21 = vld [vmem:[%s2344_s9 + $0x8] sm:$0xff]  ;;  %v723_v55 = vld [vmem:[%s2343_s2 + $0x30] sm:$0xff] }
  0x15   :  { %650 = vmatpush.bf16.msrb.mxu3 %v1318_v21  ;;  %v1320_v22 = vld [vmem:[%s2346_s13 + $0x8] sm:$0xff]  ;;  %v1317_v23 = vld [vmem:[%s2344_s9] sm:$0xff]  ;;  %v724_v56 = vld [vmem:[%s2343_s2 + $0x38] sm:$0xff] }
  0x16   :  { %1208 = vmatmul.msk.bf16.gmra.mxu0 %vm101_vm1, %v77_v14  ;;  %v409_v14 = vld [vmem:[%s2338_s1 + $0xc0] sm:$0xff]  ;;  %980 = vmatpush.bf16.msrb.mxu2 %v1320_v22  ;;  %v722_v36 = vld [vmem:[%s2343_s2 + $0x28] sm:$0xff]  ;;  %v745_v59 = vpack.c.bf16 %v724_v56, %v723_v55 }
  0x17   :  { %1246 = vmatmul.msk.bf16.gmra.mxu2 %vm101_vm1, %v411_v15  ;;  %v422_v15 = vpack.c.bf16 %v409_v14, %v409_v14  ;;  %319 = vmatpush.bf16.msrb.mxu1 %v1314_v20  ;;  %v1775_v28 = vld [vmem:[%s2340_s4] ss:$0 sm:$0xff] }
  0x18   :  { %1215 = vmatmul.msk.bf16.gmra.mxu1 %vm101_vm1, %v84_v30  ;;  %1253 = vmatmul.msk.bf16.gmra.mxu3 %vm101_vm1, %v418_v33  ;;  %v1782_v31 = vld [vmem:[%s2341_s8] ss:$0 sm:$0xff] }
  0x19   :  { %651 = vmatpush.bf16.msrb.mxu3 %v1317_v23  ;;  %v721_v35 = vld [vmem:[%s2343_s2 + $0x20] sm:$0xff] }
  0x1a   :  { %v725_v12 = vld [vmem:[%s2343_s2 + $0x40] sm:$0xff] }
  0x26   :  { %1209 = vmatmul.msk.bf16.gmra.mxu0 %vm101_vm1, %v78_v26  ;;  %v743_v26 = vpack.c.bf16 %v720_v25, %v719_v24 }
  0x27   :  { %1247 = vmatmul.msk.bf16.gmra.mxu2 %vm101_vm1, %v412_v27 }
  0x28   :  { %1216 = vmatmul.msk.bf16.gmra.mxu1 %vm101_vm1, %v85_v42  ;;  %1254 = vmatmul.msk.bf16.gmra.mxu3 %vm101_vm1, %v419_v45 }
  0x36   :  { %1210 = vmatmul.msk.bf16.gmra.mxu0 %vm101_vm1, %v79_v38 }
  0x37   :  { %1248 = vmatmul.msk.bf16.gmra.mxu2 %vm101_vm1, %v413_v39  ;;  %v744_v39 = vpack.c.bf16 %v722_v36, %v721_v35  ;;  %v727_v35 = vld [vmem:[%s2343_s2 + $0x50] sm:$0xff]  ;;  %v728_v36 = vld [vmem:[%s2343_s2 + $0x58] sm:$0xff] }
  0x38   :  { %1217 = vmatmul.msk.bf16.gmra.mxu1 %vm101_vm1, %v86_v54  ;;  %1255 = vmatmul.msk.bf16.gmra.mxu3 %vm101_vm1, %v420_v57 }
  0x46   :  { %1211 = vmatmul.msk.bf16.gmra.mxu0 %vm101_vm1, %v80_v50 }
  0x47   :  { %1249 = vmatmul.msk.bf16.gmra.mxu2 %vm101_vm1, %v414_v51 }
  0x48   :  { %1218 = vmatmul.msk.bf16.gmra.mxu1 %vm101_vm1, %v87_v2  ;;  %1256 = vmatmul.msk.bf16.gmra.mxu3 %vm101_vm1, %v421_v5 }
  0x56   :  { %1212 = vmatmul.msk.bf16.gmra.mxu0 %vm101_vm1, %v81_v62 }
  0x57   :  { %1250 = vmatmul.msk.bf16.gmra.mxu2 %vm101_vm1, %v415_v63 }
  0x58   :  { %1219 = vmatmul.msk.bf16.gmra.mxu1 %vm101_vm1, %v88_v13  ;;  %1257 = vmatmul.msk.bf16.gmra.mxu3 %vm101_vm1, %v422_v15  ;;  %v726_v13 = vld [vmem:[%s2343_s2 + $0x48] sm:$0xff] }
  0x59   :  { %v746_v17 = vpack.c.bf16 %v726_v13, %v725_v12 }
  0x66   :  { %1213 = vmatmul.msk.bf16.gmra.mxu0 %vm101_vm1, %v82_v10 }
  0x67   :  { %1251 = vmatmul.msk.bf16.gmra.mxu2 %vm101_vm1, %v416_v11  ;;  %v1319_v11 = vld [vmem:[%s2346_s13] sm:$0xff] }
  0x68   :  { %981 = vmatpush.bf16.msrb.mxu2 %v1319_v11 }
  0x76   :  { %1279 = vmatmul.msk.bf16.vlgmr.msrb.gmra.mxu0 %vm760_vm2, %v742_v19 }
  0x83   :  { %v150_v27 = vpop.f32.mrf.mxu0 }
  0x84   :  { %v151_v29 = vadd.f32 %v1775_v28, %v150_v27 }
  0x85   :  { %v1793_v43 = vpop.f32.mrf.mxu1 }
  0x86   :  { %1280 = vmatmul.msk.bf16.gmra.mxu0 %vm760_vm2, %v743_v26  ;;  %1329 = vtanh.f32 %v151_v29 }
  0x8a   :  { %v483_v30 = vpop.f32.mrf.mxu2 }
  0x8b   :  { %v152_v32 = vpop.f32.mrf.mxu0  ;;  %v484_v34 = vadd.f32 %v1782_v31, %v483_v30  ;;  %v1803_v54 = vpop.f32.mrf.mxu3 }
  0x8c   :  { %v153_v33 = vadd.f32 %v1775_v28, %v152_v32  ;;  %v1330_v40 = vpop.eup %1329 }
  0x8d   :  { %v1799_v52 = vpop.f32.mrf.mxu1 }
  0x8e   :  { %1331 = vtanh.f32 %v153_v33 }
  0x8f   :  { %1333 = vtanh.f32 %v484_v34 }
  0x92   :  { %v485_v37 = vpop.f32.mrf.mxu2 }
  0x93   :  { %v486_v38 = vadd.f32 %v1782_v31, %v485_v37  ;;  %v155_v41 = vpop.f32.mrf.mxu0  ;;  %v1816_v1 = vpop.f32.mrf.mxu3 }
  0x94   :  { %v1332_v42 = vpop.eup %1331  ;;  %v156_v46 = vadd.f32 %v1775_v28, %v155_v41 }
  0x95   :  { %1335 = vtanh.f32 %v486_v38  ;;  %v239_v44 = vpack.c.bf16 %v1332_v42, %v1330_v40  ;;  %v1334_v45 = vpop.eup %1333  ;;  %v1812_v63 = vpop.f32.mrf.mxu1  ;;  %v747_v40 = vpack.c.bf16 %v728_v36, %v727_v35 }
  0x96   :  { %1281 = vmatmul.msk.bf16.gmra.mxu0 %vm760_vm2, %v744_v39  ;;  %1337 = vtanh.f32 %v156_v46 }
  0x97   :  { %1228 = vmatmul.msk.bf16.vlgmr.msrb.gmra.mxu1 %vm272_vm3, %v239_v44 }
  0x9a   :  { %v488_v47 = vpop.f32.mrf.mxu2 }
  0x9b   :  { %v1336_v48 = vpop.eup %1335  ;;  %v157_v49 = vpop.f32.mrf.mxu0  ;;  %v489_v53 = vadd.f32 %v1782_v31, %v488_v47 }
  0x9c   :  { %v572_v50 = vpack.c.bf16 %v1336_v48, %v1334_v45  ;;  %v158_v51 = vadd.f32 %v1775_v28, %v157_v49  ;;  %v1338_v60 = vpop.eup %1337  ;;  %v1833_v14 = vpop.f32.mrf.mxu3 }
  0x9d   :  { %v1820_v9 = vpop.f32.mrf.mxu1 }
  0x9e   :  { %1266 = vmatmul.msk.bf16.vlgmr.msrb.gmra.mxu3 %vm272_vm3, %v572_v50  ;;  %1339 = vtanh.f32 %v158_v51 }
  0x9f   :  { %1341 = vtanh.f32 %v489_v53 }
  0xa2   :  { %v490_v57 = vpop.f32.mrf.mxu2 }
  0xa3   :  { %v491_v58 = vadd.f32 %v1782_v31, %v490_v57  ;;  %v160_v61 = vpop.f32.mrf.mxu0 }
  0xa4   :  { %v1340_v62 = vpop.eup %1339  ;;  %v161_v3 = vadd.f32 %v1775_v28, %v160_v61  ;;  %v1840_v23 = vpop.f32.mrf.mxu3 }
  0xa5   :  { %1343 = vtanh.f32 %v491_v58  ;;  %v240_v0 = vpack.c.bf16 %v1340_v62, %v1338_v60  ;;  %v1342_v2 = vpop.eup %1341  ;;  %v1836_v21 = vpop.f32.mrf.mxu1  ;;  %v730_v60 = vld [vmem:[%s2343_s2 + $0x68] sm:$0xff] }
  0xa6   :  { %1282 = vmatmul.msk.bf16.gmra.mxu0 %vm760_vm2, %v745_v59  ;;  %1345 = vtanh.f32 %v161_v3  ;;  %v729_v59 = vld [vmem:[%s2343_s2 + $0x60] sm:$0xff] }
  0xa7   :  { %1229 = vmatmul.msk.bf16.gmra.mxu1 %vm272_vm3, %v240_v0 }
  0xaa   :  { %v493_v4 = vpop.f32.mrf.mxu2 }
  0xab   :  { %v1344_v5 = vpop.eup %1343  ;;  %v162_v6 = vpop.f32.mrf.mxu0  ;;  %v494_v10 = vadd.f32 %v1782_v31, %v493_v4 }
  0xac   :  { %v573_v7 = vpack.c.bf16 %v1344_v5, %v1342_v2  ;;  %v163_v8 = vadd.f32 %v1775_v28, %v162_v6  ;;  %v1346_v18 = vpop.eup %1345  ;;  %v1854_v37 = vpop.f32.mrf.mxu3  ;;  %v748_v2 = vpack.c.bf16 %v730_v60, %v729_v59 }
  0xad   :  { %v1844_v33 = vpop.f32.mrf.mxu1 }
  0xae   :  { %1267 = vmatmul.msk.bf16.gmra.mxu3 %vm272_vm3, %v573_v7  ;;  %1347 = vtanh.f32 %v163_v8 }
  0xaf   :  { %1349 = vtanh.f32 %v494_v10 }
  0xb2   :  { %v495_v15 = vpop.f32.mrf.mxu2 }
  0xb3   :  { %v496_v16 = vadd.f32 %v1782_v31, %v495_v15  ;;  %v165_v19 = vpop.f32.mrf.mxu0 }
  0xb4   :  { %v1348_v20 = vpop.eup %1347  ;;  %v166_v25 = vadd.f32 %v1775_v28, %v165_v19  ;;  %v1861_v47 = vpop.f32.mrf.mxu3 }
  0xb5   :  { %1351 = vtanh.f32 %v496_v16  ;;  %v241_v22 = vpack.c.bf16 %v1348_v20, %v1346_v18  ;;  %v1350_v24 = vpop.eup %1349  ;;  %v1857_v45 = vpop.f32.mrf.mxu1  ;;  %v731_v20 = vld [vmem:[%s2343_s2 + $0x70] sm:$0xff] }
  0xb6   :  { %1283 = vmatmul.msk.bf16.gmra.mxu0 %vm760_vm2, %v746_v17  ;;  %1353 = vtanh.f32 %v166_v25 }
  0xb7   :  { %1230 = vmatmul.msk.bf16.gmra.mxu1 %vm272_vm3, %v241_v22  ;;  %v732_v22 = vld [vmem:[%s2343_s2 + $0x78] sm:$0xff] }
  0xba   :  { %v498_v26 = vpop.f32.mrf.mxu2 }
  0xbb   :  { %v1352_v27 = vpop.eup %1351  ;;  %v167_v29 = vpop.f32.mrf.mxu0  ;;  %v499_v34 = vadd.f32 %v1782_v31, %v498_v26 }
  0xbc   :  { %v574_v30 = vpack.c.bf16 %v1352_v27, %v1350_v24  ;;  %v168_v32 = vadd.f32 %v1775_v28, %v167_v29  ;;  %v1354_v41 = vpop.eup %1353  ;;  %v1875_v61 = vpop.f32.mrf.mxu3  ;;  %v749_v27 = vpack.c.bf16 %v732_v22, %v731_v20 }
  0xbd   :  { %v1865_v57 = vpop.f32.mrf.mxu1 }
  0xbe   :  { %1268 = vmatmul.msk.bf16.gmra.mxu3 %vm272_vm3, %v574_v30  ;;  %1355 = vtanh.f32 %v168_v32 }
  0xbf   :  { %1357 = vtanh.f32 %v499_v34 }
  0xc2   :  { %v500_v38 = vpop.f32.mrf.mxu2 }
  0xc3   :  { %v501_v39 = vadd.f32 %v1782_v31, %v500_v38  ;;  %v170_v42 = vpop.f32.mrf.mxu0 }
  0xc4   :  { %v1356_v44 = vpop.eup %1355  ;;  %v171_v49 = vadd.f32 %v1775_v28, %v170_v42  ;;  %v1882_v8 = vpop.f32.mrf.mxu3 }
  0xc5   :  { %1359 = vtanh.f32 %v501_v39  ;;  %v242_v46 = vpack.c.bf16 %v1356_v44, %v1354_v41  ;;  %v1358_v48 = vpop.eup %1357  ;;  %v1878_v6 = vpop.f32.mrf.mxu1 }
  0xc6   :  { %1284 = vmatmul.msk.bf16.gmra.mxu0 %vm760_vm2, %v747_v40  ;;  %1361 = vtanh.f32 %v171_v49 }
  0xc7   :  { %1231 = vmatmul.msk.bf16.gmra.mxu1 %vm272_vm3, %v242_v46 }
  0xca   :  { %v503_v50 = vpop.f32.mrf.mxu2 }
  0xcb   :  { %v1360_v51 = vpop.eup %1359  ;;  %v172_v53 = vpop.f32.mrf.mxu0  ;;  %v504_v58 = vadd.f32 %v1782_v31, %v503_v50  ;;  %v733_v50 = vld [vmem:[%s2343_s2 + $0x80] sm:$0xff] }
  0xcc   :  { %v575_v55 = vpack.c.bf16 %v1360_v51, %v1358_v48  ;;  %v173_v56 = vadd.f32 %v1775_v28, %v172_v53  ;;  %v1362_v3 = vpop.eup %1361  ;;  %v1896_v24 = vpop.f32.mrf.mxu3  ;;  %v734_v51 = vld [vmem:[%s2343_s2 + $0x88] sm:$0xff] }
  0xcd   :  { %v1886_v18 = vpop.f32.mrf.mxu1 }
  0xce   :  { %1269 = vmatmul.msk.bf16.gmra.mxu3 %vm272_vm3, %v575_v55  ;;  %1363 = vtanh.f32 %v173_v56 }
  0xcf   :  { %1365 = vtanh.f32 %v504_v58  ;;  %v750_v58 = vpack.c.bf16 %v734_v51, %v733_v50 }
  0xd2   :  { %v505_v62 = vpop.f32.mrf.mxu2 }
  0xd3   :  { %v506_v0 = vadd.f32 %v1782_v31, %v505_v62  ;;  %v175_v4 = vpop.f32.mrf.mxu0 }
  0xd4   :  { %v1364_v5 = vpop.eup %1363  ;;  %v176_v11 = vadd.f32 %v1775_v28, %v175_v4  ;;  %v1903_v36 = vpop.f32.mrf.mxu3  ;;  %v186_v4 = vadd.f32 %v1775_v28, %v1793_v43  ;;  %v735_v43 = vld [vmem:[%s2343_s2 + $0x90] sm:$0xff] }
  0xd5   :  { %1367 = vtanh.f32 %v506_v0  ;;  %v243_v7 = vpack.c.bf16 %v1364_v5, %v1362_v3  ;;  %v1366_v10 = vpop.eup %1365  ;;  %v1899_v34 = vpop.f32.mrf.mxu1  ;;  %v1921_v0 = vld [vmem:[%s2345_s12] ss:$0 sm:$0xff] }
  0xd6   :  { %1285 = vmatmul.msk.bf16.gmra.mxu0 %vm760_vm2, %v748_v2  ;;  %1369 = vtanh.f32 %v176_v11  ;;  %v519_v11 = vadd.f32 %v1782_v31, %v1803_v54  ;;  %v736_v54 = vld [vmem:[%s2343_s2 + $0x98] sm:$0xff] }
  0xd7   :  { %1232 = vmatmul.msk.bf16.gmra.mxu1 %vm272_vm3, %v243_v7 }
  0xda   :  { %v508_v12 = vpop.f32.mrf.mxu2 }
  0xdb   :  { %v1368_v13 = vpop.eup %1367  ;;  %v177_v15 = vpop.f32.mrf.mxu0  ;;  %v509_v19 = vadd.f32 %v1782_v31, %v508_v12 }
  0xdc   :  { %v576_v16 = vpack.c.bf16 %v1368_v13, %v1366_v10  ;;  %v178_v17 = vadd.f32 %v1775_v28, %v177_v15  ;;  %v1370_v29 = vpop.eup %1369  ;;  %v1915_v53 = vpop.f32.mrf.mxu3  ;;  %v521_v15 = vadd.f32 %v1782_v31, %v1816_v1 }
  0xdd   :  { %v212_v48 = vpop.f32.mrf.mxu1 }
  0xde   :  { %1270 = vmatmul.msk.bf16.gmra.mxu3 %vm272_vm3, %v576_v16  ;;  %1371 = vtanh.f32 %v178_v17  ;;  %v188_v17 = vadd.f32 %v1775_v28, %v1799_v52 }
  0xdf   :  { %1373 = vtanh.f32 %v509_v19  ;;  %v751_v19 = vpack.c.bf16 %v736_v54, %v735_v43 }
  0xe2   :  { %v510_v25 = vpop.f32.mrf.mxu2 }
  0xe3   :  { %v511_v26 = vadd.f32 %v1782_v31, %v510_v25  ;;  %v180_v30 = vpop.f32.mrf.mxu0 }
  0xe4   :  { %v1372_v32 = vpop.eup %1371  ;;  %v181_v39 = vadd.f32 %v1775_v28, %v180_v30  ;;  %v545_v5 = vpop.f32.mrf.mxu3  ;;  %v191_v30 = vadd.f32 %v1775_v28, %v1812_v63  ;;  %v737_v63 = vld [vmem:[%s2343_s2 + $0xa0] sm:$0xff] }
  0xe5   :  { %1375 = vtanh.f32 %v511_v26  ;;  %v244_v35 = vpack.c.bf16 %v1372_v32, %v1370_v29  ;;  %v1374_v38 = vpop.eup %1373  ;;  %v531_v5 = vadd.f32 %v1782_v31, %v1861_v47  ;;  %v739_v47 = vld [vmem:[%s2343_s2 + $0xb0] sm:$0xff] }
  0xe6   :  { %1286 = vmatmul.msk.bf16.gmra.mxu0 %vm760_vm2, %v749_v27  ;;  %1377 = vtanh.f32 %v181_v39  ;;  %v524_v39 = vadd.f32 %v1782_v31, %v1833_v14  ;;  %v738_v14 = vld [vmem:[%s2343_s2 + $0xa8] sm:$0xff] }
  0xe7   :  { %1233 = vmatmul.msk.bf16.gmra.mxu1 %vm272_vm3, %v244_v35 }
  0xea   :  { %v513_v40 = vpop.f32.mrf.mxu2 }
  0xeb   :  { %v1376_v41 = vpop.eup %1375  ;;  %v182_v42 = vpop.f32.mrf.mxu0  ;;  %v514_v49 = vadd.f32 %v1782_v31, %v513_v40 }
  0xec   :  { %v577_v44 = vpack.c.bf16 %v1376_v41, %v1374_v38  ;;  %v183_v46 = vadd.f32 %v1775_v28, %v182_v42  ;;  %v1378_v59 = vpop.eup %1377  ;;  %v526_v41 = vadd.f32 %v1782_v31, %v1840_v23 }
  0xee   :  { %1271 = vmatmul.msk.bf16.gmra.mxu3 %vm272_vm3, %v577_v44  ;;  %1379 = vtanh.f32 %v183_v46  ;;  %v193_v44 = vadd.f32 %v1775_v28, %v1820_v9  ;;  %v752_v46 = vpack.c.bf16 %v738_v14, %v737_v63  ;;  %v203_v14 = vadd.f32 %v1775_v28, %v1865_v57 }
  0xef   :  { %1381 = vtanh.f32 %v514_v49 }
  0xf2   :  { %v515_v55 = vpop.f32.mrf.mxu2 }
  0xf3   :  { %v516_v56 = vadd.f32 %v1782_v31, %v515_v55  ;;  %v813_v60 = vpop.f32.mrf.mxu0 }
  0xf4   :  { %v1380_v62 = vpop.eup %1379  ;;  %v814_v7 = vadd.f32 %v1921_v0, %v813_v60 }
  0xf5   :  { %1383 = vtanh.f32 %v516_v56  ;;  %v245_v2 = vpack.c.bf16 %v1380_v62, %v1378_v59  ;;  %v1382_v3 = vpop.eup %1381  ;;  %v196_v59 = vadd.f32 %v1775_v28, %v1836_v21  ;;  %v198_v21 = vadd.f32 %v1775_v28, %v1844_v33  ;;  %v740_v33 = vld [vmem:[%s2343_s2 + $0xb8] sm:$0xff] }
  0xf6   :  { %1287 = vmatmul.msk.bf16.gmra.mxu0 %vm760_vm2, %v750_v58  ;;  %1385 = vtanh.f32 %v186_v4 }
  0xf7   :  { %1234 = vmatmul.msk.bf16.gmra.mxu1 %vm272_vm3, %v245_v2  ;;  %1387 = vtanh.f32 %v814_v7 }
  0xfb   :  { %v1384_v10 = vpop.eup %1383  ;;  %v815_v12 = vpop.f32.mrf.mxu0 }
  0xfc   :  { %v578_v13 = vpack.c.bf16 %v1384_v10, %v1382_v3  ;;  %v816_v16 = vadd.f32 %v1921_v0, %v815_v12  ;;  %v1386_v1 = vpop.eup %1385  ;;  %v529_v3 = vadd.f32 %v1782_v31, %v1854_v37  ;;  %v1983_v37 = vld [vmem:[%s2348_s10] ss:$0 sm:$0xff] }
  0xfd   :  { %v1388_v20 = vpop.eup %1387 }
  0xfe   :  { %1272 = vmatmul.msk.bf16.gmra.mxu3 %vm272_vm3, %v578_v13  ;;  %1389 = vtanh.f32 %v816_v16 }
  0xff   :  { %1391 = vtanh.f32 %v519_v11  ;;  %v1978_v11 = vld [vmem:[%s2347_s6] ss:$0 sm:$0xff] }
 0x100   :  { %1393 = vtanh.f32 %v521_v15 }
 0x101   :  { %1395 = vtanh.f32 %v188_v17  ;;  %v753_v17 = vpack.c.bf16 %v740_v33, %v739_v47 }
 0x102   :  { %1397 = vtanh.f32 %v191_v30 }
 0x103   :  { %v818_v22 = vpop.f32.mrf.mxu0 }
 0x104   :  { %v1390_v52 = vpop.eup %1389  ;;  %v819_v32 = vadd.f32 %v1921_v0, %v818_v22 }
 0x105   :  { %v1392_v25 = vpop.eup %1391  ;;  %v902_v26 = vpack.c.bf16 %v1390_v52, %v1388_v20 }
 0x106   :  { %v1394_v27 = vpop.eup %1393  ;;  %1288 = vmatmul.msk.bf16.gmra.mxu0 %vm760_vm2, %v751_v19  ;;  %1399 = vtanh.f32 %v819_v32 }
 0x107   :  { %v1396_v29 = vpop.eup %1395  ;;  %1300 = vmatmul.msk.bf16.vlgmr.msrb.gmra.mxu2 %vm272_vm3, %v902_v26  ;;  %v579_v35 = vpack.c.bf16 %v1394_v27, %v1392_v25  ;;  %v201_v27 = vadd.f32 %v1775_v28, %v1857_v45 }
 0x108   :  { %v246_v38 = vpack.c.bf16 %v1396_v29, %v1386_v1  ;;  %v1398_v23 = vpop.eup %1397 }
 0x10a   :  { %1235 = vmatmul.msk.bf16.gmra.mxu1 %vm272_vm3, %v246_v38 }
 0x10b   :  { %v820_v40 = vpop.f32.mrf.mxu0 }
 0x10c   :  { %v821_v42 = vadd.f32 %v1921_v0, %v820_v40  ;;  %v1400_v48 = vpop.eup %1399  ;;  %v534_v40 = vadd.f32 %v1782_v31, %v1875_v61  ;;  %v741_v61 = vld [vmem:[%s2343_s2 + $0xc0] sm:$0xff] }
 0x10e   :  { %1273 = vmatmul.msk.bf16.gmra.mxu3 %vm272_vm3, %v579_v35  ;;  %1401 = vtanh.f32 %v821_v42 }
 0x10f   :  { %1403 = vtanh.f32 %v524_v39 }
 0x110   :  { %1405 = vtanh.f32 %v526_v41 }
 0x111   :  { %1407 = vtanh.f32 %v193_v44  ;;  %v536_v44 = vadd.f32 %v1782_v31, %v1882_v8 }
 0x112   :  { %1409 = vtanh.f32 %v196_v59 }
 0x113   :  { %v823_v49 = vpop.f32.mrf.mxu0 }
 0x114   :  { %v1402_v9 = vpop.eup %1401  ;;  %v321_v50 = vpop.f32.mrf.mxu1  ;;  %v824_v60 = vadd.f32 %v1921_v0, %v823_v49  ;;  %v754_v49 = vpack.c.bf16 %v741_v61, %v741_v61 }
 0x115   :  { %v1404_v51 = vpop.eup %1403  ;;  %v903_v55 = vpack.c.bf16 %v1402_v9, %v1400_v48  ;;  %v322_v13 = vadd.f32 %v1978_v11, %v321_v50 }
 0x116   :  { %v1406_v56 = vpop.eup %1405  ;;  %1289 = vmatmul.msk.bf16.gmra.mxu0 %vm760_vm2, %v752_v46  ;;  %1411 = vtanh.f32 %v824_v60 }
 0x117   :  { %v1408_v58 = vpop.eup %1407  ;;  %1301 = vmatmul.msk.bf16.gmra.mxu2 %vm272_vm3, %v903_v55  ;;  %v580_v62 = vpack.c.bf16 %v1406_v56, %v1404_v51 }
 0x118   :  { %v247_v2 = vpack.c.bf16 %v1408_v58, %v1398_v23  ;;  %v1410_v16 = vpop.eup %1409 }
 0x11a   :  { %1236 = vmatmul.msk.bf16.gmra.mxu1 %vm272_vm3, %v247_v2 }
 0x11b   :  { %v825_v4 = vpop.f32.mrf.mxu0 }
 0x11c   :  { %v826_v7 = vadd.f32 %v1921_v0, %v825_v4  ;;  %v323_v10 = vpop.f32.mrf.mxu1  ;;  %v1412_v43 = vpop.eup %1411 }
 0x11d   :  { %v324_v30 = vadd.f32 %v1978_v11, %v323_v10 }
 0x11e   :  { %1274 = vmatmul.msk.bf16.gmra.mxu3 %vm272_vm3, %v580_v62  ;;  %1413 = vtanh.f32 %v826_v7  ;;  %v206_v62 = vadd.f32 %v1775_v28, %v1878_v6 }
 0x11f   :  { %1415 = vtanh.f32 %v529_v3 }
 0x120   :  { %1417 = vtanh.f32 %v531_v5 }
 0x121   :  { %v653_v12 = vpop.f32.mrf.mxu3  ;;  %1419 = vtanh.f32 %v198_v21  ;;  %v539_v21 = vadd.f32 %v1782_v31, %v1896_v24 }
 0x122   :  { %v654_v15 = vadd.f32 %v1983_v37, %v653_v12  ;;  %1421 = vtanh.f32 %v201_v27  ;;  %v541_v12 = vadd.f32 %v1782_v31, %v1903_v36 }
 0x123   :  { %v828_v1 = vpop.f32.mrf.mxu0 }
 0x124   :  { %v1994_v54 = vmul.f32 %v654_v15, %v322_v13  ;;  %v1414_v19 = vpop.eup %1413  ;;  %v326_v20 = vpop.f32.mrf.mxu1  ;;  %v829_v32 = vadd.f32 %v1921_v0, %v828_v1  ;;  %v208_v15 = vadd.f32 %v1775_v28, %v1886_v18 }
 0x125   :  { %v1416_v22 = vpop.eup %1415  ;;  %v904_v52 = vpack.c.bf16 %v1414_v19, %v1412_v43  ;;  %v327_v8 = vadd.f32 %v1978_v11, %v326_v20 }
 0x126   :  { %v1418_v25 = vpop.eup %1417  ;;  %1290 = vmatmul.msk.bf16.gmra.mxu0 %vm760_vm2, %v753_v17  ;;  %1423 = vtanh.f32 %v829_v32 }
 0x127   :  { %v1420_v26 = vpop.eup %1419  ;;  %1302 = vmatmul.msk.bf16.gmra.mxu2 %vm272_vm3, %v904_v52  ;;  %v581_v38 = vpack.c.bf16 %v1418_v25, %v1416_v22 }
 0x128   :  { %v248_v39 = vpack.c.bf16 %v1420_v26, %v1410_v16  ;;  %v1422_v48 = vpop.eup %1421 }
 0x129   :  { %v655_v29 = vpop.f32.mrf.mxu3 }
 0x12a   :  { %v656_v35 = vadd.f32 %v1983_v37, %v655_v29  ;;  %1237 = vmatmul.msk.bf16.gmra.mxu1 %vm272_vm3, %v248_v39  ;;  %v211_v39 = vadd.f32 %v1775_v28, %v1899_v34 }
 0x12b   :  { %v830_v42 = vpop.f32.mrf.mxu0 }
 0x12c   :  { %v2005_v41 = vmul.f32 %v656_v35, %v324_v30  ;;  %v831_v45 = vadd.f32 %v1921_v0, %v830_v42  ;;  %v328_v63 = vpop.f32.mrf.mxu1  ;;  %v1424_v9 = vpop.eup %1423 }
 0x12d   :  { %v329_v3 = vadd.f32 %v1978_v11, %v328_v63 }
 0x12e   :  { %1275 = vmatmul.msk.bf16.gmra.mxu3 %vm272_vm3, %v581_v38  ;;  %1425 = vtanh.f32 %v831_v45 }
 0x12f   :  { %1427 = vtanh.f32 %v534_v40 }
 0x130   :  { %1429 = vtanh.f32 %v536_v44  ;;  %v544_v44 = vadd.f32 %v1782_v31, %v1915_v53 }
 0x131   :  { %v658_v23 = vpop.f32.mrf.mxu3  ;;  %1431 = vtanh.f32 %v203_v14 }
 0x132   :  { %v659_v46 = vadd.f32 %v1983_v37, %v658_v23  ;;  %1433 = vtanh.f32 %v206_v62 }
 0x133   :  { %v833_v50 = vpop.f32.mrf.mxu0 }
 0x134   :  { %v2019_v57 = vmul.f32 %v659_v46, %v327_v8  ;;  %v1426_v51 = vpop.eup %1425  ;;  %v331_v55 = vpop.f32.mrf.mxu1  ;;  %v834_v4 = vadd.f32 %v1921_v0, %v833_v50 }
 0x135   :  { %v1428_v56 = vpop.eup %1427  ;;  %v905_v58 = vpack.c.bf16 %v1426_v51, %v1424_v9  ;;  %v332_v16 = vadd.f32 %v1978_v11, %v331_v55 }
 0x136   :  { %v1430_v59 = vpop.eup %1429  ;;  %1291 = vmatmul.msk.bf16.gmra.mxu0 %vm760_vm2, %v754_v49  ;;  %1435 = vtanh.f32 %v834_v4 }
 0x137   :  { %v1432_v60 = vpop.eup %1431  ;;  %1303 = vmatmul.msk.bf16.gmra.mxu2 %vm272_vm3, %v905_v58  ;;  %v582_v7 = vpack.c.bf16 %v1430_v59, %v1428_v56 }
 0x138   :  { %v249_v10 = vpack.c.bf16 %v1432_v60, %v1422_v48  ;;  %v1434_v17 = vpop.eup %1433 }
 0x139   :  { %v660_v2 = vpop.f32.mrf.mxu3 }
 0x13a   :  { %v661_v5 = vadd.f32 %v1983_v37, %v660_v2  ;;  %1238 = vmatmul.msk.bf16.gmra.mxu1 %vm272_vm3, %v249_v10 }
 0x13b   :  { %v835_v33 = vpop.f32.mrf.mxu0 }
 0x13c   :  { %v2030_v47 = vmul.f32 %v661_v5, %v329_v3  ;;  %v836_v6 = vadd.f32 %v1921_v0, %v835_v33  ;;  %v333_v13 = vpop.f32.mrf.mxu1  ;;  %v1436_v43 = vpop.eup %1435 }
 0x13d   :  { %v334_v29 = vadd.f32 %v1978_v11, %v333_v13 }
 0x13e   :  { %1276 = vmatmul.msk.bf16.gmra.mxu3 %vm272_vm3, %v582_v7  ;;  %1437 = vtanh.f32 %v836_v6 }
 0x13f   :  { %1439 = vtanh.f32 %v539_v21 }
 0x140   :  { %1441 = vtanh.f32 %v541_v12 }
 0x141   :  { %v663_v24 = vpop.f32.mrf.mxu3  ;;  %1443 = vtanh.f32 %v208_v15 }
 0x142   :  { %v664_v36 = vadd.f32 %v1983_v37, %v663_v24 }
 0x143   :  { %v838_v19 = vpop.f32.mrf.mxu0 }
 0x144   :  { %v2041_v1 = vmul.f32 %v664_v36, %v332_v16  ;;  %v1438_v20 = vpop.eup %1437  ;;  %v336_v22 = vpop.f32.mrf.mxu1  ;;  %v839_v30 = vadd.f32 %v1921_v0, %v838_v19 }
 0x145   :  { %v1440_v18 = vpop.eup %1439  ;;  %v906_v52 = vpack.c.bf16 %v1438_v20, %v1436_v43  ;;  %v337_v28 = vadd.f32 %v1978_v11, %v336_v22 }
 0x146   :  { %v1442_v25 = vpop.eup %1441  ;;  %1445 = vtanh.f32 %v839_v30 }
 0x147   :  { %v1444_v26 = vpop.eup %1443  ;;  %1304 = vmatmul.msk.bf16.gmra.mxu2 %vm272_vm3, %v906_v52  ;;  %v583_v35 = vpack.c.bf16 %v1442_v25, %v1440_v18 }
 0x148   :  { %v250_v38 = vpack.c.bf16 %v1444_v26, %v1434_v17 }
 0x149   :  { %v665_v27 = vpop.f32.mrf.mxu3 }
 0x14a   :  { %v666_v32 = vadd.f32 %v1983_v37, %v665_v27  ;;  %1239 = vmatmul.msk.bf16.gmra.mxu1 %vm272_vm3, %v250_v38 }
 0x14b   :  { %v840_v42 = vpop.f32.mrf.mxu0 }
 0x14c   :  { %v2049_v40 = vmul.f32 %v666_v32, %v334_v29  ;;  %v841_v45 = vadd.f32 %v1921_v0, %v840_v42  ;;  %v338_v63 = vpop.f32.mrf.mxu1  ;;  %v1446_v61 = vpop.eup %1445 }
 0x14d   :  { %v339_v55 = vadd.f32 %v1978_v11, %v338_v63 }
 0x14e   :  { %1277 = vmatmul.msk.bf16.gmra.mxu3 %vm272_vm3, %v583_v35  ;;  %1447 = vtanh.f32 %v841_v45 }
 0x14f   :  { %1449 = vtanh.f32 %v211_v39 }
 0x150   :  { %1451 = vtanh.f32 %v544_v44 }
 0x151   :  { %v668_v14 = vpop.f32.mrf.mxu3 }
 0x152   :  { %v669_v34 = vadd.f32 %v1983_v37, %v668_v14 }
 0x153   :  { %v843_v31 = vpop.f32.mrf.mxu0 }
 0x154   :  { %v2058_v23 = vmul.f32 %v669_v34, %v337_v28  ;;  %v1448_v53 = vpop.eup %1447  ;;  %v341_v8 = vpop.f32.mrf.mxu1  ;;  %v844_v56 = vadd.f32 %v1921_v0, %v843_v31 }
 0x155   :  { %v1450_v46 = vpop.eup %1449  ;;  %v907_v48 = vpack.c.bf16 %v1448_v53, %v1446_v61  ;;  %v342_v4 = vadd.f32 %v1978_v11, %v341_v8 }
 0x156   :  { %v1452_v49 = vpop.eup %1451  ;;  %v251_v9 = vpack.c.bf16 %v1450_v46, %v1450_v46  ;;  %1453 = vtanh.f32 %v844_v56 }
 0x157   :  { %1305 = vmatmul.msk.bf16.gmra.mxu2 %vm272_vm3, %v907_v48  ;;  %v584_v51 = vpack.c.bf16 %v1452_v49, %v1452_v49  ;;  %v2099_v48 = vld [vmem:[%s2349_s14] ss:$0 sm:$0xff] }
 0x159   :  { %v670_v50 = vpop.f32.mrf.mxu3 }
 0x15a   :  { %v671_v58 = vadd.f32 %v1983_v37, %v670_v50  ;;  %1240 = vmatmul.msk.bf16.gmra.mxu1 %vm272_vm3, %v251_v9 }
 0x15b   :  { %v845_v60 = vpop.f32.mrf.mxu0 }
 0x15c   :  { %v2064_v59 = vmul.f32 %v671_v58, %v339_v55  ;;  %v846_v62 = vadd.f32 %v1921_v0, %v845_v60  ;;  %v343_v2 = vpop.f32.mrf.mxu1  ;;  %v1454_v7 = vpop.eup %1453 }
 0x15d   :  { %v344_v15 = vadd.f32 %v1978_v11, %v343_v2 }
 0x15e   :  { %1278 = vmatmul.msk.bf16.gmra.mxu3 %vm272_vm3, %v584_v51  ;;  %1455 = vtanh.f32 %v846_v62 }
 0x161   :  { %v673_v3 = vpop.f32.mrf.mxu3 }
 0x162   :  { %v674_v5 = vadd.f32 %v1983_v37, %v673_v3 }
 0x163   :  { %v848_v21 = vpop.f32.mrf.mxu0 }
 0x164   :  { %v2071_v10 = vmul.f32 %v674_v5, %v342_v4  ;;  %v1456_v33 = vpop.eup %1455  ;;  %v346_v12 = vpop.f32.mrf.mxu1  ;;  %v849_v24 = vadd.f32 %v1921_v0, %v848_v21 }
 0x165   :  { %v908_v6 = vpack.c.bf16 %v1456_v33, %v1454_v7  ;;  %v347_v22 = vadd.f32 %v1978_v11, %v346_v12 }
 0x166   :  { %1457 = vtanh.f32 %v849_v24 }
 0x167   :  { %1306 = vmatmul.msk.bf16.gmra.mxu2 %vm272_vm3, %v908_v6 }
 0x169   :  { %v675_v13 = vpop.f32.mrf.mxu3 }
 0x16a   :  { %v676_v16 = vadd.f32 %v1983_v37, %v675_v13 }
 0x16b   :  { %v850_v17 = vpop.f32.mrf.mxu0 }
 0x16c   :  { %v2077_v36 = vmul.f32 %v676_v16, %v344_v15  ;;  %v851_v43 = vadd.f32 %v1921_v0, %v850_v17  ;;  %v348_v19 = vpop.f32.mrf.mxu1  ;;  %v1458_v52 = vpop.eup %1457 }
 0x16d   :  { %v349_v35 = vadd.f32 %v1978_v11, %v348_v19 }
 0x16e   :  { %1459 = vtanh.f32 %v851_v43 }
 0x171   :  { %v678_v20 = vpop.f32.mrf.mxu3 }
 0x172   :  { %v679_v18 = vadd.f32 %v1983_v37, %v678_v20 }
 0x173   :  { %v853_v26 = vpop.f32.mrf.mxu0 }
 0x174   :  { %v2082_v25 = vmul.f32 %v679_v18, %v347_v22  ;;  %v1460_v27 = vpop.eup %1459  ;;  %v351_v30 = vpop.f32.mrf.mxu1  ;;  %v854_v38 = vadd.f32 %v1921_v0, %v853_v26 }
 0x175   :  { %v909_v29 = vpack.c.bf16 %v1460_v27, %v1458_v52  ;;  %v352_v14 = vadd.f32 %v1978_v11, %v351_v30 }
 0x176   :  { %1461 = vtanh.f32 %v854_v38 }
 0x177   :  { %1307 = vmatmul.msk.bf16.gmra.mxu2 %vm272_vm3, %v909_v29 }
 0x179   :  { %v680_v32 = vpop.f32.mrf.mxu3 }
 0x17a   :  { %v681_v39 = vadd.f32 %v1983_v37, %v680_v32 }
 0x17b   :  { %v855_v44 = vpop.f32.mrf.mxu0 }
 0x17c   :  { %v2088_v42 = vmul.f32 %v681_v39, %v349_v35  ;;  %v856_v45 = vadd.f32 %v1921_v0, %v855_v44  ;;  %v353_v28 = vpop.f32.mrf.mxu1  ;;  %v1462_v61 = vpop.eup %1461 }
 0x17d   :  { %v354_v9 = vadd.f32 %v1978_v11, %v353_v28 }
 0x17e   :  { %1463 = vtanh.f32 %v856_v45 }
 0x181   :  { %v683_v63 = vpop.f32.mrf.mxu3 }
 0x182   :  { %v684_v34 = vadd.f32 %v1983_v37, %v683_v63 }
 0x183   :  { %v858_v53 = vpop.f32.mrf.mxu0 }
 0x184   :  { %v2093_v31 = vmul.f32 %v684_v34, %v352_v14  ;;  %v1464_v8 = vpop.eup %1463  ;;  %v859_v50 = vadd.f32 %v1921_v0, %v858_v53 }
 0x185   :  { %v910_v46 = vpack.c.bf16 %v1464_v8, %v1462_v61 }
 0x186   :  { %1465 = vtanh.f32 %v859_v50 }
 0x187   :  { %1308 = vmatmul.msk.bf16.gmra.mxu2 %vm272_vm3, %v910_v46  ;;  %v356_v55 = vpop.f32.mrf.mxu1 }
 0x188   :  { %v357_v5 = vadd.f32 %v1978_v11, %v356_v55 }
 0x189   :  { %v685_v49 = vpop.f32.mrf.mxu3 }
 0x18a   :  { %v686_v51 = vadd.f32 %v1983_v37, %v685_v49  ;;  %v983_v56 = vpop.f32.mrf.mxu2 }
 0x18b   :  { %v984_v60 = vadd.f32 %v2099_v48, %v983_v56  ;;  %v860_v62 = vpop.f32.mrf.mxu0 }
 0x18c   :  { %v2104_v58 = vmul.f32 %v686_v51, %v354_v9  ;;  %v861_v2 = vadd.f32 %v1921_v0, %v860_v62  ;;  %v1466_v6 = vpop.eup %1465 }
 0x18d   :  { %v1072_v3 = vmul.f32 %v1994_v54, %v984_v60 }
 0x18e   :  { %1467 = vtanh.f32 %v861_v2 }
 0x18f   :  { %v1098_v4 = vsel %vm1097_vm4, %v1072_v3, 0.0  ;;  %v358_v33 = vpop.f32.mrf.mxu1 }
 0x190   :  { %1099 = vadd.xlane.f32.xlu0 %v1098_v4  ;;  %v359_v19 = vadd.f32 %v1978_v11, %v358_v33 }
 0x191   :  { %v688_v7 = vpop.f32.mrf.mxu3 }
 0x192   :  { %v689_v21 = vadd.f32 %v1983_v37, %v688_v7  ;;  %v985_v12 = vpop.f32.mrf.mxu2 }
 0x193   :  { %v986_v13 = vadd.f32 %v2099_v48, %v985_v12  ;;  %v863_v15 = vpop.f32.mrf.mxu0 }
 0x194   :  { %v2113_v24 = vmul.f32 %v689_v21, %v357_v5  ;;  %v1468_v16 = vpop.eup %1467  ;;  %v864_v22 = vadd.f32 %v1921_v0, %v863_v15 }
 0x195   :  { %v911_v17 = vpack.c.bf16 %v1468_v16, %v1466_v6  ;;  %v1073_v54 = vmul.f32 %v2005_v41, %v986_v13 }
 0x196   :  { %1469 = vtanh.f32 %v864_v22 }
 0x197   :  { %1309 = vmatmul.msk.bf16.gmra.mxu2 %vm272_vm3, %v911_v17  ;;  %v1101_v43 = vsel %vm1097_vm4, %v1073_v54, 0.0  ;;  %v361_v52 = vpop.f32.mrf.mxu1 }
 0x198   :  { %1102 = vadd.xlane.f32.xlu0 %v1101_v43  ;;  %v362_v38 = vadd.f32 %v1978_v11, %v361_v52 }
 0x199   :  { %v690_v20 = vpop.f32.mrf.mxu3 }
 0x19a   :  { %v691_v18 = vadd.f32 %v1983_v37, %v690_v20  ;;  %v988_v26 = vpop.f32.mrf.mxu2 }
 0x19b   :  { %v989_v27 = vadd.f32 %v2099_v48, %v988_v26  ;;  %v865_v29 = vpop.f32.mrf.mxu0 }
 0x19c   :  { %v2122_v30 = vmul.f32 %v691_v18, %v359_v19  ;;  %v866_v41 = vadd.f32 %v1921_v0, %v865_v29  ;;  %v1470_v14 = vpop.eup %1469 }
 0x19d   :  { %v1074_v32 = vmul.f32 %v2019_v57, %v989_v27 }
 0x19e   :  { %1471 = vtanh.f32 %v866_v41 }
 0x19f   :  { %v1104_v35 = vsel %vm1097_vm4, %v1074_v32, 0.0  ;;  %v363_v45 = vpop.f32.mrf.mxu1 }
 0x1a0   :  { %1105 = vadd.xlane.f32.xlu1 %v1104_v35  ;;  %v364_v49 = vadd.f32 %v1978_v11, %v363_v45 }
 0x1a1   :  { %v693_v39 = vpop.f32.mrf.mxu3 }
 0x1a2   :  { %v694_v44 = vadd.f32 %v1983_v37, %v693_v39  ;;  %v990_v63 = vpop.f32.mrf.mxu2 }
 0x1a3   :  { %v991_v28 = vadd.f32 %v2099_v48, %v990_v63  ;;  %v868_v34 = vpop.f32.mrf.mxu0 }
 0x1a4   :  { %v2130_v61 = vmul.f32 %v694_v44, %v362_v38  ;;  %v1472_v53 = vpop.eup %1471  ;;  %v869_v50 = vadd.f32 %v1921_v0, %v868_v34 }
 0x1a5   :  { %v912_v8 = vpack.c.bf16 %v1472_v53, %v1470_v14  ;;  %v1075_v57 = vmul.f32 %v2030_v47, %v991_v28 }
 0x1a6   :  { %1473 = vtanh.f32 %v869_v50 }
 0x1a7   :  { %1310 = vmatmul.msk.bf16.gmra.mxu2 %vm272_vm3, %v912_v8  ;;  %v1107_v46 = vsel %vm1097_vm4, %v1075_v57, 0.0  ;;  %v366_v55 = vpop.f32.mrf.mxu1 }
 0x1a8   :  { %1108 = vadd.xlane.f32.xlu1 %v1107_v46  ;;  %v367_v5 = vadd.f32 %v1978_v11, %v366_v55 }
 0x1a9   :  { %v695_v9 = vpop.f32.mrf.mxu3 }
 0x1aa   :  { %v696_v51 = vadd.f32 %v1983_v37, %v695_v9  ;;  %v993_v56 = vpop.f32.mrf.mxu2 }
 0x1ab   :  { %v994_v60 = vadd.f32 %v2099_v48, %v993_v56  ;;  %v870_v62 = vpop.f32.mrf.mxu0 }
 0x1ac   :  { %v2139_v2 = vmul.f32 %v696_v51, %v364_v49  ;;  %v871_v47 = vadd.f32 %v1921_v0, %v870_v62  ;;  %v1474_v6 = vpop.eup %1473 }
 0x1ad   :  { %v1076_v3 = vmul.f32 %v2041_v1, %v994_v60 }
 0x1ae   :  { %1475 = vtanh.f32 %v871_v47 }
 0x1af   :  { %v1110_v4 = vsel %vm1097_vm4, %v1076_v3, 0.0  ;;  %v368_v33 = vpop.f32.mrf.mxu1 }
 0x1b0   :  { %1111 = vadd.xlane.f32.xlu2 %v1110_v4  ;;  %v369_v20 = vadd.f32 %v1978_v11, %v368_v33 }
 0x1b1   :  { %v698_v7 = vpop.f32.mrf.mxu3 }
 0x1b2   :  { %v699_v21 = vadd.f32 %v1983_v37, %v698_v7  ;;  %v995_v12 = vpop.f32.mrf.mxu2 }
 0x1b3   :  { %v996_v13 = vadd.f32 %v2099_v48, %v995_v12  ;;  %v873_v15 = vpop.f32.mrf.mxu0 }
 0x1b4   :  { %v2147_v16 = vmul.f32 %v699_v21, %v367_v5  ;;  %v1476_v17 = vpop.eup %1475  ;;  %v874_v43 = vadd.f32 %v1921_v0, %v873_v15 }
 0x1b5   :  { %v913_v54 = vpack.c.bf16 %v1476_v17, %v1474_v6  ;;  %v1077_v1 = vmul.f32 %v2049_v40, %v996_v13 }
 0x1b6   :  { %1477 = vtanh.f32 %v874_v43 }
 0x1b7   :  { %1311 = vmatmul.msk.bf16.gmra.mxu2 %vm272_vm3, %v913_v54  ;;  %v1113_v19 = vsel %vm1097_vm4, %v1077_v1, 0.0  ;;  %v371_v52 = vpop.f32.mrf.mxu1 }
 0x1b8   :  { %1114 = vadd.xlane.f32.xlu2 %v1113_v19  ;;  %v372_v32 = vadd.f32 %v1978_v11, %v371_v52 }
 0x1b9   :  { %v700_v22 = vpop.f32.mrf.mxu3 }
 0x1ba   :  { %v701_v18 = vadd.f32 %v1983_v37, %v700_v22  ;;  %v998_v26 = vpop.f32.mrf.mxu2 }
 0x1bb   :  { %v999_v27 = vadd.f32 %v2099_v48, %v998_v26  ;;  %v875_v29 = vpop.f32.mrf.mxu0 }
 0x1bc   :  { %v2156_v41 = vmul.f32 %v701_v18, %v369_v20  ;;  %v1478_v35 = vpop.eup %1477 }
 0x1bd   :  { %v1078_v0 = vmul.f32 %v2058_v23, %v999_v27  ;;  %v914_v63 = vpack.c.bf16 %v1478_v35, %v1478_v35 }
 0x1bf   :  { %v1116_v40 = vsel %vm1097_vm4, %v1078_v0, 0.0  ;;  %v373_v44 = vpop.f32.mrf.mxu1 }
 0x1c0   :  { %1117 = vadd.xlane.f32.xlu0 %v1116_v40  ;;  %v374_v53 = vadd.f32 %v1978_v11, %v373_v44 }
 0x1c1   :  { %v703_v38 = vpop.f32.mrf.mxu3 }
 0x1c2   :  { %v704_v39 = vadd.f32 %v1983_v37, %v703_v38  ;;  %v1000_v45 = vpop.f32.mrf.mxu2 }
 0x1c3   :  { %v1001_v14 = vadd.f32 %v2099_v48, %v1000_v45 }
 0x1c4   :  { %v2163_v28 = vmul.f32 %v704_v39, %v372_v32 }
 0x1c5   :  { %v1079_v34 = vmul.f32 %v2064_v59, %v1001_v14 }
 0x1c7   :  { %1312 = vmatmul.msk.bf16.gmra.mxu2 %vm272_vm3, %v914_v63  ;;  %v1119_v23 = vsel %vm1097_vm4, %v1079_v34, 0.0  ;;  %v376_v46 = vpop.f32.mrf.mxu1 }
 0x1c8   :  { %1120 = vadd.xlane.f32.xlu1 %v1119_v23  ;;  %v377_v55 = vadd.f32 %v1978_v11, %v376_v46 }
 0x1c9   :  { %v705_v8 = vpop.f32.mrf.mxu3 }
 0x1ca   :  { %v706_v57 = vadd.f32 %v1983_v37, %v705_v8  ;;  %v1003_v49 = vpop.f32.mrf.mxu2 }
 0x1cb   :  { %v1004_v9 = vadd.f32 %v2099_v48, %v1003_v49 }
 0x1cc   :  { %v2171_v50 = vmul.f32 %v706_v57, %v374_v53 }
 0x1cd   :  { %v1080_v51 = vmul.f32 %v2071_v10, %v1004_v9 }
 0x1cf   :  { %v1122_v59 = vsel %vm1097_vm4, %v1080_v51, 0.0  ;;  %v378_v62 = vpop.f32.mrf.mxu1 }
 0x1d0   :  { %1123 = vadd.xlane.f32.xlu2 %v1122_v59  ;;  %v379_v10 = vadd.f32 %v1978_v11, %v378_v62 }
 0x1d1   :  { %v708_v56 = vpop.f32.mrf.mxu3 }
 0x1d2   :  { %v709_v60 = vadd.f32 %v1983_v37, %v708_v56  ;;  %v1005_v47 = vpop.f32.mrf.mxu2 }
 0x1d3   :  { %v1006_v3 = vadd.f32 %v2099_v48, %v1005_v47 }
 0x1d4   :  { %v2178_v4 = vmul.f32 %v709_v60, %v377_v55 }
 0x1d5   :  { %v1081_v5 = vmul.f32 %v2077_v36, %v1006_v3 }
 0x1d7   :  { %v1125_v7 = vsel %vm1097_vm4, %v1081_v5, 0.0  ;;  %v381_v12 = vpop.f32.mrf.mxu1 }
 0x1d8   :  { %1126 = vadd.xlane.f32.xlu0 %v1125_v7  ;;  %v382_v36 = vadd.f32 %v1978_v11, %v381_v12 }
 0x1d9   :  { %v710_v21 = vpop.f32.mrf.mxu3 }
 0x1da   :  { %v711_v33 = vadd.f32 %v1983_v37, %v710_v21  ;;  %v1008_v6 = vpop.f32.mrf.mxu2 }
 0x1db   :  { %v1009_v13 = vadd.f32 %v2099_v48, %v1008_v6 }
 0x1dc   :  { %v2185_v15 = vmul.f32 %v711_v33, %v379_v10 }
 0x1dd   :  { %v1082_v17 = vmul.f32 %v2082_v25, %v1009_v13 }
 0x1df   :  { %v1128_v54 = vsel %vm1097_vm4, %v1082_v17, 0.0  ;;  %v383_v19 = vpop.f32.mrf.mxu1 }
 0x1e0   :  { %1129 = vadd.xlane.f32.xlu1 %v1128_v54 }
 0x1e1   :  { %v713_v1 = vpop.f32.mrf.mxu3 }
 0x1e2   :  { %v714_v43 = vadd.f32 %v1983_v37, %v713_v1  ;;  %v1010_v20 = vpop.f32.mrf.mxu2 }
 0x1e3   :  { %v1011_v22 = vadd.f32 %v2099_v48, %v1010_v20 }
 0x1e4   :  { %v2192_v18 = vmul.f32 %v714_v43, %v382_v36 }
 0x1e5   :  { %v1083_v52 = vmul.f32 %v2088_v42, %v1011_v22 }
 0x1e7   :  { %v1131_v26 = vsel %vm1097_vm4, %v1083_v52, 0.0 }
 0x1e8   :  { %1132 = vadd.xlane.f32.xlu2 %v1131_v26 }
 0x1e9   :  { %v715_v25 = vpop.f32.mrf.mxu3 }
 0x1ea   :  { %v1013_v27 = vpop.f32.mrf.mxu2 }
 0x1eb   :  { %v1014_v29 = vadd.f32 %v2099_v48, %v1013_v27 }
 0x1ed   :  { %v1084_v11 = vmul.f32 %v2093_v31, %v1014_v29 }
 0x1ef   :  { %v1134_v0 = vsel %vm1097_vm4, %v1084_v11, 0.0 }
 0x1f0   :  { %1135 = vadd.xlane.f32.xlu0 %v1134_v0 }
 0x1f2   :  { %v1015_v37 = vpop.f32.mrf.mxu2 }
 0x1f3   :  { %v1016_v40 = vadd.f32 %v2099_v48, %v1015_v37 }
 0x1f5   :  { %v1085_v32 = vmul.f32 %v2104_v58, %v1016_v40 }
 0x1f7   :  { %v1137_v35 = vsel %vm1097_vm4, %v1085_v32, 0.0 }
 0x1f8   :  { %1138 = vadd.xlane.f32.xlu1 %v1137_v35 }
 0x1fa   :  { %v1018_v42 = vpop.f32.mrf.mxu2 }
 0x1fb   :  { %v1019_v38 = vadd.f32 %v2099_v48, %v1018_v42 }
 0x1fd   :  { %v1086_v39 = vmul.f32 %v2113_v24, %v1019_v38 }
 0x1ff   :  { %v1140_v44 = vsel %vm1097_vm4, %v1086_v39, 0.0 }
 0x200   :  { %1141 = vadd.xlane.f32.xlu2 %v1140_v44 }
 0x202   :  { %v1020_v31 = vpop.f32.mrf.mxu2 }
 0x203   :  { %v1021_v45 = vadd.f32 %v2099_v48, %v1020_v31  ;;  %v1100_v63 = vpop.xlane.xlu0 %1099 }
 0x204   :  { %1174 = vst.msk [vmem:[%s2350_s15] sm:$0xff] %vm1173_vm5, %v1100_v63 }
 0x205   :  { %v1087_v58 = vmul.f32 %v2122_v30, %v1021_v45 }
 0x207   :  { %v1143_v14 = vsel %vm1097_vm4, %v1087_v58, 0.0 }
 0x208   :  { %1144 = vadd.xlane.f32.xlu0 %v1143_v14 }
 0x20a   :  { %v1023_v34 = vpop.f32.mrf.mxu2 }
 0x20b   :  { %v1024_v24 = vadd.f32 %v2099_v48, %v1023_v34  ;;  %v1103_v23 = vpop.xlane.xlu0 %1102 }
 0x20c   :  { %1175 = vst.msk [vmem:[%s2350_s15 + $0x8] sm:$0xff] %vm1173_vm5, %v1103_v23 }
 0x20d   :  { %v1088_v53 = vmul.f32 %v2130_v61, %v1024_v24 }
 0x20f   :  { %v1146_v8 = vsel %vm1097_vm4, %v1088_v53, 0.0 }
 0x210   :  { %1147 = vadd.xlane.f32.xlu1 %v1146_v8 }
 0x212   :  { %v1025_v57 = vpop.f32.mrf.mxu2 }
 0x213   :  { %v1026_v30 = vadd.f32 %v2099_v48, %v1025_v57  ;;  %v1106_v46 = vpop.xlane.xlu1 %1105 }
 0x214   :  { %1176 = vst.msk [vmem:[%s2350_s15 + $0x10] sm:$0xff] %vm1173_vm5, %v1106_v46 }
 0x215   :  { %v1089_v49 = vmul.f32 %v2139_v2, %v1026_v30 }
 0x217   :  { %v1149_v9 = vsel %vm1097_vm4, %v1089_v49, 0.0 }
 0x218   :  { %1150 = vadd.xlane.f32.xlu2 %v1149_v9 }
 0x21a   :  { %v1028_v51 = vpop.f32.mrf.mxu2 }
 0x21b   :  { %v1029_v61 = vadd.f32 %v2099_v48, %v1028_v51  ;;  %v1109_v59 = vpop.xlane.xlu1 %1108 }
 0x21c   :  { %1177 = vst.msk [vmem:[%s2350_s15 + $0x18] sm:$0xff] %vm1173_vm5, %v1109_v59 }
 0x21d   :  { %v1090_v55 = vmul.f32 %v2147_v16, %v1029_v61 }
 0x21f   :  { %v1152_v56 = vsel %vm1097_vm4, %v1090_v55, 0.0 }
 0x220   :  { %1153 = vadd.xlane.f32.xlu0 %v1152_v56 }
 0x222   :  { %v1030_v60 = vpop.f32.mrf.mxu2 }
 0x223   :  { %v1031_v2 = vadd.f32 %v2099_v48, %v1030_v60  ;;  %v1112_v62 = vpop.xlane.xlu2 %1111 }
 0x224   :  { %1178 = vst.msk [vmem:[%s2350_s15 + $0x20] sm:$0xff] %vm1173_vm5, %v1112_v62 }
 0x225   :  { %v1091_v47 = vmul.f32 %v2156_v41, %v1031_v2 }
 0x227   :  { %v1155_v3 = vsel %vm1097_vm4, %v1091_v47, 0.0 }
 0x228   :  { %1156 = vadd.xlane.f32.xlu1 %v1155_v3 }
 0x22a   :  { %v1033_v5 = vpop.f32.mrf.mxu2 }
 0x22b   :  { %v1034_v16 = vadd.f32 %v2099_v48, %v1033_v5  ;;  %v1115_v7 = vpop.xlane.xlu2 %1114 }
 0x22c   :  { %1179 = vst.msk [vmem:[%s2350_s15 + $0x28] sm:$0xff] %vm1173_vm5, %v1115_v7 }
 0x22d   :  { %v1092_v10 = vmul.f32 %v2163_v28, %v1034_v16 }
 0x22f   :  { %v1158_v21 = vsel %vm1097_vm4, %v1092_v10, 0.0 }
 0x230   :  { %1159 = vadd.xlane.f32.xlu2 %v1158_v21 }
 0x232   :  { %v1035_v33 = vpop.f32.mrf.mxu2 }
 0x233   :  { %v1036_v41 = vadd.f32 %v2099_v48, %v1035_v33  ;;  %v1118_v12 = vpop.xlane.xlu0 %1117 }
 0x234   :  { %1180 = vst.msk [vmem:[%s2350_s15 + $0x30] sm:$0xff] %vm1173_vm5, %v1118_v12 }
 0x235   :  { %v1093_v6 = vmul.f32 %v2171_v50, %v1036_v41 }
 0x237   :  { %v1161_v13 = vsel %vm1097_vm4, %v1093_v6, 0.0 }
 0x238   :  { %1162 = vadd.xlane.f32.xlu0 %v1161_v13 }
 0x23a   :  { %v1038_v17 = vpop.f32.mrf.mxu2 }
 0x23b   :  { %v1039_v28 = vadd.f32 %v2099_v48, %v1038_v17  ;;  %v1121_v54 = vpop.xlane.xlu1 %1120 }
 0x23c   :  { %1181 = vst.msk [vmem:[%s2350_s15 + $0x38] sm:$0xff] %vm1173_vm5, %v1121_v54 }
 0x23d   :  { %v1094_v36 = vmul.f32 %v2178_v4, %v1039_v28 }
 0x23f   :  { %v1164_v1 = vsel %vm1097_vm4, %v1094_v36, 0.0 }
 0x240   :  { %1165 = vadd.xlane.f32.xlu1 %v1164_v1 }
 0x242   :  { %v1040_v43 = vpop.f32.mrf.mxu2 }
 0x243   :  { %v1041_v50 = vadd.f32 %v2099_v48, %v1040_v43  ;;  %v1124_v19 = vpop.xlane.xlu2 %1123 }
 0x244   :  { %1182 = vst.msk [vmem:[%s2350_s15 + $0x40] sm:$0xff] %vm1173_vm5, %v1124_v19 }
 0x245   :  { %v1095_v20 = vmul.f32 %v2185_v15, %v1041_v50 }
 0x247   :  { %v1167_v22 = vsel %vm1097_vm4, %v1095_v20, 0.0 }
 0x248   :  { %1168 = vadd.xlane.f32.xlu2 %v1167_v22 }
 0x24a   :  { %v1043_v52 = vpop.f32.mrf.mxu2 }
 0x24b   :  { %v1044_v4 = vadd.f32 %v2099_v48, %v1043_v52  ;;  %v1127_v26 = vpop.xlane.xlu0 %1126 }
 0x24c   :  { %1183 = vst.msk [vmem:[%s2350_s15 + $0x48] sm:$0xff] %vm1173_vm5, %v1127_v26 }
 0x24d   :  { %v1096_v25 = vmul.f32 %v2192_v18, %v1044_v4 }
 0x24f   :  { %v1170_v27 = vsel %vm1097_vm4, %v1096_v25, 0.0 }
 0x250   :  { %1171 = vadd.xlane.f32.xlu0 %v1170_v27 }
 0x252   :  { %v1045_v29 = vpop.f32.mrf.mxu2 }
 0x253   :  { %v1130_v11 = vpop.xlane.xlu1 %1129 }
 0x254   :  { %1184 = vst.msk [vmem:[%s2350_s15 + $0x50] sm:$0xff] %vm1173_vm5, %v1130_v11 }
 0x25b   :  { %v1133_v15 = vpop.xlane.xlu2 %1132 }
 0x25c   :  { %1185 = vst.msk [vmem:[%s2350_s15 + $0x58] sm:$0xff] %vm1173_vm5, %v1133_v15 }
 0x263   :  { %v1136_v48 = vpop.xlane.xlu0 %1135 }
 0x264   :  { %1186 = vst.msk [vmem:[%s2350_s15 + $0x60] sm:$0xff] %vm1173_vm5, %v1136_v48 }
 0x26b   :  { %v1139_v18 = vpop.xlane.xlu1 %1138 }
 0x26c   :  { %1187 = vst.msk [vmem:[%s2350_s15 + $0x68] sm:$0xff] %vm1173_vm5, %v1139_v18 }
 0x273   :  { %v1142_v0 = vpop.xlane.xlu2 %1141 }
 0x274   :  { %1188 = vst.msk [vmem:[%s2350_s15 + $0x70] sm:$0xff] %vm1173_vm5, %v1142_v0 }
 0x27b   :  { %v1145_v37 = vpop.xlane.xlu0 %1144 }
 0x27c   :  { %1189 = vst.msk [vmem:[%s2350_s15 + $0x78] sm:$0xff] %vm1173_vm5, %v1145_v37 }
 0x283   :  { %v1148_v40 = vpop.xlane.xlu1 %1147 }
 0x284   :  { %1190 = vst.msk [vmem:[%s2350_s15 + $0x80] sm:$0xff] %vm1173_vm5, %v1148_v40 }
 0x28b   :  { %v1151_v32 = vpop.xlane.xlu2 %1150 }
 0x28c   :  { %1191 = vst.msk [vmem:[%s2350_s15 + $0x88] sm:$0xff] %vm1173_vm5, %v1151_v32 }
 0x293   :  { %v1154_v35 = vpop.xlane.xlu0 %1153 }
 0x294   :  { %1192 = vst.msk [vmem:[%s2350_s15 + $0x90] sm:$0xff] %vm1173_vm5, %v1154_v35 }
 0x29b   :  { %v1157_v42 = vpop.xlane.xlu1 %1156 }
 0x29c   :  { %1193 = vst.msk [vmem:[%s2350_s15 + $0x98] sm:$0xff] %vm1173_vm5, %v1157_v42 }
 0x2a3   :  { %v1160_v38 = vpop.xlane.xlu2 %1159 }
 0x2a4   :  { %1194 = vst.msk [vmem:[%s2350_s15 + $0xa0] sm:$0xff] %vm1173_vm5, %v1160_v38 }
 0x2ab   :  { %v1163_v39 = vpop.xlane.xlu0 %1162 }
 0x2ac   :  { %1195 = vst.msk [vmem:[%s2350_s15 + $0xa8] sm:$0xff] %vm1173_vm5, %v1163_v39 }
 0x2b3   :  { %v1166_v44 = vpop.xlane.xlu1 %1165 }
 0x2b4   :  { %1196 = vst.msk [vmem:[%s2350_s15 + $0xb0] sm:$0xff] %vm1173_vm5, %v1166_v44 }
 0x2bb   :  { %v1169_v31 = vpop.xlane.xlu2 %1168 }
 0x2bc   :  { %1197 = vst.msk [vmem:[%s2350_s15 + $0xb8] sm:$0xff] %vm1173_vm5, %v1169_v31 }
 0x2c3   :  { %v1172_v45 = vpop.xlane.xlu0 %1171 }
 0x2c4   :  { %1198 = vst.msk [vmem:[%s2350_s15 + $0xc0] sm:$0xff] %vm1173_vm5, %v1172_v45 }

</bundles_post_ra>
